<compile_context>
chip_gen: v6e
topology: v6e:2x2x1
jax: 0.10.0
libtpu: 0.0.40
codegen_flags: <defaults>
</compile_context>

<pallas_src>
import jax
import jax.numpy as jnp
from jax import lax
from jax.experimental import pallas as pl
from jax.experimental.pallas import tpu as pltpu

K = 5      # depthwise kernel size
PAD = 2    # spatial padding
EPS = 1e-5


def dwsep_kernel(x_ref, wd_ref, wps_ref, shift_ref, o_ref, xpf_ref):
    """Fused depthwise(5x5) -> pointwise(1x1) -> BN(eval) -> ReLU for one image.

    x_ref     : (1, Cin, H, W)              raw NCHW input block
    wd_ref    : (K*K, Cin*(W+2P))           depthwise weights, lane-expanded
    wps_ref   : (Cin, Cout*W)               pointwise * BN-scale, lane-expanded
    shift_ref : (1, Cout*W)                 BN shift, lane-expanded
    o_ref     : (1, H, Cout*W)              lane-dense output slab
    xpf_ref   : VMEM (H+2P, Cin*(W+2P)+K-1) padded channel-blocked input scratch
    """
    _, cin, H, W = x_ref.shape
    cout_w = o_ref.shape[2]
    wpad = W + 2 * PAD
    cw = cin * wpad
    cout = cout_w // W

    # --- Build the padded, channel-blocked input slab in VMEM (padding happens
    #     in-kernel, not as an extra HBM pass in the wrapper).
    #     Lane layout: l = c*wpad + j, j in [0, wpad).
    zc = jnp.zeros((H, PAD), jnp.float32)
    parts = []
    for c in range(cin):
        parts += [zc, x_ref[0, c], zc]
    parts.append(jnp.zeros((H, K - 1), jnp.float32))   # halo so kw-shifted reads stay in bounds
    mid = jnp.concatenate(parts, axis=1)               # (H, cw + K - 1)
    ztb = jnp.zeros((PAD, cw + K - 1), jnp.float32)
    xpf_ref[...] = jnp.concatenate([ztb, mid, ztb], axis=0)

    # --- Depthwise 5x5, stride 1: 25 lane-dense shifted multiply-accumulates on
    #     the VPU; the (kh, kw) shifts are cheap offset loads from the scratch.
    acc = jnp.zeros((H, cw), jnp.float32)
    for kh in range(K):
        for kw in range(K):
            i = kh * K + kw
            acc = acc + xpf_ref[kh:kh + H, kw:kw + cw] * wd_ref[i:i + 1, :]

    # --- Pointwise 1x1 (+ folded BN scale) as Cin broadcast-MACs on the VPU.
    out = jnp.zeros((H, cout_w), jnp.float32)
    for c in range(cin):
        dwc = acc[:, c * wpad:c * wpad + W]            # (H, W) valid depthwise cols
        tiled = jnp.concatenate([dwc] * cout, axis=1)  # (H, Cout*W)
        out = out + tiled * wps_ref[c:c + 1, :]

    # --- BN shift + ReLU, exactly-128-lane dense store.
    o_ref[0] = jnp.maximum(out + shift_ref[...], 0.0)


def depthwise_separable_conv(x_nchw, dw_w, pw_w, gamma, beta, rmean, rvar,
                             eps=EPS):
    """x_nchw: (N, Cin, H, W); dw_w: (Cin, 1, K, K); pw_w: (Cout, Cin, 1, 1)."""
    N, Cin, H, W = x_nchw.shape
    Cout = pw_w.shape[0]
    wpad = W + 2 * PAD
    cw = Cin * wpad

    x = x_nchw.astype(jnp.float32)

    # Host-side weight prep (tiny, O(K*K*Cin*W) — no per-pixel HBM passes):
    # fold the BN scale into the pointwise weights and lane-expand everything
    # so the kernel only does lane-dense broadcast-MACs.
    wd = jnp.transpose(dw_w[:, 0, :, :], (1, 2, 0)).astype(jnp.float32)    # (K, K, Cin)
    wd_lane = jnp.repeat(wd, wpad, axis=-1).reshape(K * K, cw)             # (K*K, Cin*wpad)

    scale = (gamma / jnp.sqrt(rvar + eps)).astype(jnp.float32)             # (Cout,)
    wp = pw_w[:, :, 0, 0].astype(jnp.float32)                              # (Cout, Cin)
    wps = (wp * scale[:, None]).T                                          # (Cin, Cout), BN scale folded (f32)
    wps_lane = jnp.repeat(wps, W, axis=-1)                                 # (Cin, Cout*W)
    shift = (beta - rmean * scale).astype(jnp.float32)                     # (Cout,)
    shift_lane = jnp.repeat(shift, W).reshape(1, Cout * W)                 # (1, Cout*W)

    out_slab = pl.pallas_call(
        dwsep_kernel,
        out_shape=jax.ShapeDtypeStruct((N, H, Cout * W), jnp.float32),
        grid_spec=pltpu.PrefetchScalarGridSpec(
            num_scalar_prefetch=0,
            grid=(N,),
            in_specs=[
                pl.BlockSpec((1, Cin, H, W), lambda n: (n, 0, 0, 0)),
                pl.BlockSpec((K * K, cw), lambda n: (0, 0)),
                pl.BlockSpec((Cin, Cout * W), lambda n: (0, 0)),
                pl.BlockSpec((1, Cout * W), lambda n: (0, 0)),
            ],
            out_specs=pl.BlockSpec((1, H, Cout * W), lambda n: (n, 0, 0)),
            scratch_shapes=[
                pltpu.VMEM((H + 2 * PAD, cw + K - 1), jnp.float32),
            ],
        ),
        compiler_params=pltpu.CompilerParams(
            dimension_semantics=("parallel",)),
    )(x, wd_lane, wps_lane, shift_lane)

    # Unpack the lane-dense (H, Cout*W) slab back to NCHW (small XLA reshape;
    # lane-dense store + wrapper unpack per the perf guidance).
    return jnp.transpose(out_slab.reshape(N, H, Cout, W), (0, 2, 1, 3))


def reference(x, dw_w, pw_w, gamma, beta, rmean, rvar, eps=EPS):
    """Pure-JAX reference matching PyTorch (eval-mode BN)."""
    Cin = x.shape[1]
    y = lax.conv_general_dilated(
        x, dw_w, window_strides=(1, 1),
        padding=((PAD, PAD), (PAD, PAD)),
        feature_group_count=Cin,
        dimension_numbers=("NCHW", "OIHW", "NCHW"))
    y = lax.conv_general_dilated(
        y, pw_w, window_strides=(1, 1), padding="VALID",
        dimension_numbers=("NCHW", "OIHW", "NCHW"))
    s = gamma / jnp.sqrt(rvar + eps)
    y = y * s[None, :, None, None] + (beta - rmean * s)[None, :, None, None]
    return jnp.maximum(y, 0.0)


if __name__ == "__main__":
    N, Cin, Cout, H, W = 2, 4, 8, 16, 16

    key = jax.random.PRNGKey(0)
    kx, kd, kp, kg, kb, km, kv = jax.random.split(key, 7)

    x = jax.random.normal(kx, (N, Cin, H, W), dtype=jnp.float32)
    # nn.Conv2d(in, in, 5, groups=in, bias=False) weight: (Cin, 1, 5, 5)
    dw_w = jax.random.normal(kd, (Cin, 1, K, K), dtype=jnp.float32) * 0.1
    # nn.Conv2d(in, out, 1, bias=False) weight: (Cout, Cin, 1, 1)
    pw_w = jax.random.normal(kp, (Cout, Cin, 1, 1), dtype=jnp.float32) * 0.1
    # BatchNorm2d params / running stats (deterministic, non-trivial values).
    gamma = 1.0 + 0.1 * jax.random.normal(kg, (Cout,), dtype=jnp.float32)
    beta = 0.1 * jax.random.normal(kb, (Cout,), dtype=jnp.float32)
    rmean = 0.1 * jax.random.normal(km, (Cout,), dtype=jnp.float32)
    rvar = jnp.abs(1.0 + 0.1 * jax.random.normal(kv, (Cout,), dtype=jnp.float32))

    out = depthwise_separable_conv(x, dw_w, pw_w, gamma, beta, rmean, rvar)
    out = jax.block_until_ready(out)

    ref = reference(x, dw_w, pw_w, gamma, beta, rmean, rvar)
    assert out.shape == (N, Cout, H, W), out.shape
    assert jnp.allclose(out, ref, atol=1e-4, rtol=1e-4), (
        float(jnp.max(jnp.abs(out - ref))))

    print("KERNEL_OK")
</pallas_src>

<mosaic_0001>
module attributes {stable_mosaic.version = 11 : i64} {
  func.func @dwsep_kernel(%arg0: i32, %arg1: memref<1x4x16x16xf32, #tpu.memory_space<vmem>>, %arg2: memref<25x80xf32, #tpu.memory_space<vmem>>, %arg3: memref<4x128xf32, #tpu.memory_space<vmem>>, %arg4: memref<1x128xf32, #tpu.memory_space<vmem>>, %arg5: memref<1x16x128xf32, #tpu.memory_space<vmem>>, %arg6: memref<20x84xf32, #tpu.memory_space<vmem>>) attributes {dimension_semantics = [#tpu.dimension_semantics<parallel>], iteration_bounds = array<i64: 2>, scalar_prefetch = 0 : i64, scratch_operands = 1 : i64, tpu.core_type = #tpu.core_type<tc>, window_params = [{transform_indices = @transform_0, window_bounds = array<i64: 1, 4, 16, 16>}, {pipeline_mode = #tpu.pipeline_mode<synchronous>, transform_indices = @transform_1, window_bounds = array<i64: 25, 80>}, {pipeline_mode = #tpu.pipeline_mode<synchronous>, transform_indices = @transform_2, window_bounds = array<i64: 4, 128>}, {pipeline_mode = #tpu.pipeline_mode<synchronous>, transform_indices = @transform_3, window_bounds = array<i64: 1, 128>}, {transform_indices = @transform_4, window_bounds = array<i64: 1, 16, 128>}]} {
    %cst = arith.constant 0.000000e+00 : f32
    %0 = vector.broadcast %cst : f32 to vector<16x2xf32>
    %c0 = arith.constant 0 : index
    %c0_0 = arith.constant 0 : index
    %c0_1 = arith.constant 0 : index
    %c0_2 = arith.constant 0 : index
    %1 = vector.load %arg1[%c0, %c0_0, %c0_1, %c0_2] : memref<1x4x16x16xf32, #tpu.memory_space<vmem>>, vector<1x1x16x16xf32>
    %2 = vector.shape_cast %1 : vector<1x1x16x16xf32> to vector<16x16xf32>
    %c0_3 = arith.constant 0 : index
    %c1 = arith.constant 1 : index
    %c0_4 = arith.constant 0 : index
    %c0_5 = arith.constant 0 : index
    %3 = vector.load %arg1[%c0_3, %c1, %c0_4, %c0_5] : memref<1x4x16x16xf32, #tpu.memory_space<vmem>>, vector<1x1x16x16xf32>
    %4 = vector.shape_cast %3 : vector<1x1x16x16xf32> to vector<16x16xf32>
    %c0_6 = arith.constant 0 : index
    %c2 = arith.constant 2 : index
    %c0_7 = arith.constant 0 : index
    %c0_8 = arith.constant 0 : index
    %5 = vector.load %arg1[%c0_6, %c2, %c0_7, %c0_8] : memref<1x4x16x16xf32, #tpu.memory_space<vmem>>, vector<1x1x16x16xf32>
    %6 = vector.shape_cast %5 : vector<1x1x16x16xf32> to vector<16x16xf32>
    %c0_9 = arith.constant 0 : index
    %c3 = arith.constant 3 : index
    %c0_10 = arith.constant 0 : index
    %c0_11 = arith.constant 0 : index
    %7 = vector.load %arg1[%c0_9, %c3, %c0_10, %c0_11] : memref<1x4x16x16xf32, #tpu.memory_space<vmem>>, vector<1x1x16x16xf32>
    %8 = vector.shape_cast %7 : vector<1x1x16x16xf32> to vector<16x16xf32>
    %cst_12 = arith.constant 0.000000e+00 : f32
    %9 = vector.broadcast %cst_12 : f32 to vector<16x4xf32>
    %10 = tpu.concatenate %0, %2, %0, %0, %4, %0, %0, %6, %0, %0, %8, %0, %9 in 1 : vector<16x2xf32>, vector<16x16xf32>, vector<16x2xf32>, vector<16x2xf32>, vector<16x16xf32>, vector<16x2xf32>, vector<16x2xf32>, vector<16x16xf32>, vector<16x2xf32>, vector<16x2xf32>, vector<16x16xf32>, vector<16x2xf32>, vector<16x4xf32> -> vector<16x84xf32>
    %cst_13 = arith.constant 0.000000e+00 : f32
    %11 = vector.broadcast %cst_13 : f32 to vector<2x84xf32>
    %12 = tpu.concatenate %11, %10, %11 in 0 : vector<2x84xf32>, vector<16x84xf32>, vector<2x84xf32> -> vector<20x84xf32>
    %c0_14 = arith.constant 0 : index
    %c0_15 = arith.constant 0 : index
    %13 = vector.load %arg6[%c0_14, %c0_15] : memref<20x84xf32, #tpu.memory_space<vmem>>, vector<20x84xf32>
    tpu.vector_store %arg6[%c0_14, %c0_15], %12 {strides = array<i32>} : memref<20x84xf32, #tpu.memory_space<vmem>>, vector<20x84xf32>,
    %cst_16 = arith.constant 0.000000e+00 : f32
    %14 = vector.broadcast %cst_16 : f32 to vector<16x80xf32>
    %c0_17 = arith.constant 0 : index
    %c0_18 = arith.constant 0 : index
    %15 = vector.load %arg6[%c0_17, %c0_18] : memref<20x84xf32, #tpu.memory_space<vmem>>, vector<16x80xf32>
    %c0_19 = arith.constant 0 : index
    %c0_20 = arith.constant 0 : index
    %16 = vector.load %arg2[%c0_19, %c0_20] : memref<25x80xf32, #tpu.memory_space<vmem>>, vector<1x80xf32>
    %17 = vector.broadcast %16 : vector<1x80xf32> to vector<16x80xf32>
    %18 = arith.mulf %15, %17 : vector<16x80xf32>
    %19 = arith.addf %14, %18 : vector<16x80xf32>
    %c0_21 = arith.constant 0 : index
    %c1_22 = arith.constant 1 : index
    %20 = vector.load %arg6[%c0_21, %c1_22] : memref<20x84xf32, #tpu.memory_space<vmem>>, vector<16x80xf32>
    %c1_23 = arith.constant 1 : index
    %c0_24 = arith.constant 0 : index
    %21 = vector.load %arg2[%c1_23, %c0_24] : memref<25x80xf32, #tpu.memory_space<vmem>>, vector<1x80xf32>
    %22 = vector.broadcast %21 : vector<1x80xf32> to vector<16x80xf32>
    %23 = arith.mulf %20, %22 : vector<16x80xf32>
    %24 = arith.addf %19, %23 : vector<16x80xf32>
    %c0_25 = arith.constant 0 : index
    %c2_26 = arith.constant 2 : index
    %25 = vector.load %arg6[%c0_25, %c2_26] : memref<20x84xf32, #tpu.memory_space<vmem>>, vector<16x80xf32>
    %c2_27 = arith.constant 2 : index
    %c0_28 = arith.constant 0 : index
    %26 = vector.load %arg2[%c2_27, %c0_28] : memref<25x80xf32, #tpu.memory_space<vmem>>, vector<1x80xf32>
    %27 = vector.broadcast %26 : vector<1x80xf32> to vector<16x80xf32>
    %28 = arith.mulf %25, %27 : vector<16x80xf32>
    %29 = arith.addf %24, %28 : vector<16x80xf32>
    %c0_29 = arith.constant 0 : index
    %c3_30 = arith.constant 3 : index
    %30 = vector.load %arg6[%c0_29, %c3_30] : memref<20x84xf32, #tpu.memory_space<vmem>>, vector<16x80xf32>
    %c3_31 = arith.constant 3 : index
    %c0_32 = arith.constant 0 : index
    %31 = vector.load %arg2[%c3_31, %c0_32] : memref<25x80xf32, #tpu.memory_space<vmem>>, vector<1x80xf32>
    %32 = vector.broadcast %31 : vector<1x80xf32> to vector<16x80xf32>
    %33 = arith.mulf %30, %32 : vector<16x80xf32>
    %34 = arith.addf %29, %33 : vector<16x80xf32>
    %c0_33 = arith.constant 0 : index
    %c4 = arith.constant 4 : index
    %35 = vector.load %arg6[%c0_33, %c4] : memref<20x84xf32, #tpu.memory_space<vmem>>, vector<16x80xf32>
    %c4_34 = arith.constant 4 : index
    %c0_35 = arith.constant 0 : index
    %36 = vector.load %arg2[%c4_34, %c0_35] : memref<25x80xf32, #tpu.memory_space<vmem>>, vector<1x80xf32>
    %37 = vector.broadcast %36 : vector<1x80xf32> to vector<16x80xf32>
    %38 = arith.mulf %35, %37 : vector<16x80xf32>
    %39 = arith.addf %34, %38 : vector<16x80xf32>
    %c1_36 = arith.constant 1 : index
    %c0_37 = arith.constant 0 : index
    %40 = vector.load %arg6[%c1_36, %c0_37] : memref<20x84xf32, #tpu.memory_space<vmem>>, vector<16x80xf32>
    %c5 = arith.constant 5 : index
    %c0_38 = arith.constant 0 : index
    %41 = vector.load %arg2[%c5, %c0_38] : memref<25x80xf32, #tpu.memory_space<vmem>>, vector<1x80xf32>
    %42 = vector.broadcast %41 : vector<1x80xf32> to vector<16x80xf32>
    %43 = arith.mulf %40, %42 : vector<16x80xf32>
    %44 = arith.addf %39, %43 : vector<16x80xf32>
    %c1_39 = arith.constant 1 : index
    %c1_40 = arith.constant 1 : index
    %45 = vector.load %arg6[%c1_39, %c1_40] : memref<20x84xf32, #tpu.memory_space<vmem>>, vector<16x80xf32>
    %c6 = arith.constant 6 : index
    %c0_41 = arith.constant 0 : index
    %46 = vector.load %arg2[%c6, %c0_41] : memref<25x80xf32, #tpu.memory_space<vmem>>, vector<1x80xf32>
    %47 = vector.broadcast %46 : vector<1x80xf32> to vector<16x80xf32>
    %48 = arith.mulf %45, %47 : vector<16x80xf32>
    %49 = arith.addf %44, %48 : vector<16x80xf32>
    %c1_42 = arith.constant 1 : index
    %c2_43 = arith.constant 2 : index
    %50 = vector.load %arg6[%c1_42, %c2_43] : memref<20x84xf32, #tpu.memory_space<vmem>>, vector<16x80xf32>
    %c7 = arith.constant 7 : index
    %c0_44 = arith.constant 0 : index
    %51 = vector.load %arg2[%c7, %c0_44] : memref<25x80xf32, #tpu.memory_space<vmem>>, vector<1x80xf32>
    %52 = vector.broadcast %51 : vector<1x80xf32> to vector<16x80xf32>
    %53 = arith.mulf %50, %52 : vector<16x80xf32>
    %54 = arith.addf %49, %53 : vector<16x80xf32>
    %c1_45 = arith.constant 1 : index
    %c3_46 = arith.constant 3 : index
    %55 = vector.load %arg6[%c1_45, %c3_46] : memref<20x84xf32, #tpu.memory_space<vmem>>, vector<16x80xf32>
    %c8 = arith.constant 8 : index
    %c0_47 = arith.constant 0 : index
    %56 = vector.load %arg2[%c8, %c0_47] : memref<25x80xf32, #tpu.memory_space<vmem>>, vector<1x80xf32>
    %57 = vector.broadcast %56 : vector<1x80xf32> to vector<16x80xf32>
    %58 = arith.mulf %55, %57 : vector<16x80xf32>
    %59 = arith.addf %54, %58 : vector<16x80xf32>
    %c1_48 = arith.constant 1 : index
    %c4_49 = arith.constant 4 : index
    %60 = vector.load %arg6[%c1_48, %c4_49] : memref<20x84xf32, #tpu.memory_space<vmem>>, vector<16x80xf32>
    %c9 = arith.constant 9 : index
    %c0_50 = arith.constant 0 : index
    %61 = vector.load %arg2[%c9, %c0_50] : memref<25x80xf32, #tpu.memory_space<vmem>>, vector<1x80xf32>
    %62 = vector.broadcast %61 : vector<1x80xf32> to vector<16x80xf32>
    %63 = arith.mulf %60, %62 : vector<16x80xf32>
    %64 = arith.addf %59, %63 : vector<16x80xf32>
    %c2_51 = arith.constant 2 : index
    %c0_52 = arith.constant 0 : index
    %65 = vector.load %arg6[%c2_51, %c0_52] : memref<20x84xf32, #tpu.memory_space<vmem>>, vector<16x80xf32>
    %c10 = arith.constant 10 : index
    %c0_53 = arith.constant 0 : index
    %66 = vector.load %arg2[%c10, %c0_53] : memref<25x80xf32, #tpu.memory_space<vmem>>, vector<1x80xf32>
    %67 = vector.broadcast %66 : vector<1x80xf32> to vector<16x80xf32>
    %68 = arith.mulf %65, %67 : vector<16x80xf32>
    %69 = arith.addf %64, %68 : vector<16x80xf32>
    %c2_54 = arith.constant 2 : index
    %c1_55 = arith.constant 1 : index
    %70 = vector.load %arg6[%c2_54, %c1_55] : memref<20x84xf32, #tpu.memory_space<vmem>>, vector<16x80xf32>
    %c11 = arith.constant 11 : index
    %c0_56 = arith.constant 0 : index
    %71 = vector.load %arg2[%c11, %c0_56] : memref<25x80xf32, #tpu.memory_space<vmem>>, vector<1x80xf32>
    %72 = vector.broadcast %71 : vector<1x80xf32> to vector<16x80xf32>
    %73 = arith.mulf %70, %72 : vector<16x80xf32>
    %74 = arith.addf %69, %73 : vector<16x80xf32>
    %c2_57 = arith.constant 2 : index
    %c2_58 = arith.constant 2 : index
    %75 = vector.load %arg6[%c2_57, %c2_58] : memref<20x84xf32, #tpu.memory_space<vmem>>, vector<16x80xf32>
    %c12 = arith.constant 12 : index
    %c0_59 = arith.constant 0 : index
    %76 = vector.load %arg2[%c12, %c0_59] : memref<25x80xf32, #tpu.memory_space<vmem>>, vector<1x80xf32>
    %77 = vector.broadcast %76 : vector<1x80xf32> to vector<16x80xf32>
    %78 = arith.mulf %75, %77 : vector<16x80xf32>
    %79 = arith.addf %74, %78 : vector<16x80xf32>
    %c2_60 = arith.constant 2 : index
    %c3_61 = arith.constant 3 : index
    %80 = vector.load %arg6[%c2_60, %c3_61] : memref<20x84xf32, #tpu.memory_space<vmem>>, vector<16x80xf32>
    %c13 = arith.constant 13 : index
    %c0_62 = arith.constant 0 : index
    %81 = vector.load %arg2[%c13, %c0_62] : memref<25x80xf32, #tpu.memory_space<vmem>>, vector<1x80xf32>
    %82 = vector.broadcast %81 : vector<1x80xf32> to vector<16x80xf32>
    %83 = arith.mulf %80, %82 : vector<16x80xf32>
    %84 = arith.addf %79, %83 : vector<16x80xf32>
    %c2_63 = arith.constant 2 : index
    %c4_64 = arith.constant 4 : index
    %85 = vector.load %arg6[%c2_63, %c4_64] : memref<20x84xf32, #tpu.memory_space<vmem>>, vector<16x80xf32>
    %c14 = arith.constant 14 : index
    %c0_65 = arith.constant 0 : index
    %86 = vector.load %arg2[%c14, %c0_65] : memref<25x80xf32, #tpu.memory_space<vmem>>, vector<1x80xf32>
    %87 = vector.broadcast %86 : vector<1x80xf32> to vector<16x80xf32>
    %88 = arith.mulf %85, %87 : vector<16x80xf32>
    %89 = arith.addf %84, %88 : vector<16x80xf32>
    %c3_66 = arith.constant 3 : index
    %c0_67 = arith.constant 0 : index
    %90 = vector.load %arg6[%c3_66, %c0_67] : memref<20x84xf32, #tpu.memory_space<vmem>>, vector<16x80xf32>
    %c15 = arith.constant 15 : index
    %c0_68 = arith.constant 0 : index
    %91 = vector.load %arg2[%c15, %c0_68] : memref<25x80xf32, #tpu.memory_space<vmem>>, vector<1x80xf32>
    %92 = vector.broadcast %91 : vector<1x80xf32> to vector<16x80xf32>
    %93 = arith.mulf %90, %92 : vector<16x80xf32>
    %94 = arith.addf %89, %93 : vector<16x80xf32>
    %c3_69 = arith.constant 3 : index
    %c1_70 = arith.constant 1 : index
    %95 = vector.load %arg6[%c3_69, %c1_70] : memref<20x84xf32, #tpu.memory_space<vmem>>, vector<16x80xf32>
    %c16 = arith.constant 16 : index
    %c0_71 = arith.constant 0 : index
    %96 = vector.load %arg2[%c16, %c0_71] : memref<25x80xf32, #tpu.memory_space<vmem>>, vector<1x80xf32>
    %97 = vector.broadcast %96 : vector<1x80xf32> to vector<16x80xf32>
    %98 = arith.mulf %95, %97 : vector<16x80xf32>
    %99 = arith.addf %94, %98 : vector<16x80xf32>
    %c3_72 = arith.constant 3 : index
    %c2_73 = arith.constant 2 : index
    %100 = vector.load %arg6[%c3_72, %c2_73] : memref<20x84xf32, #tpu.memory_space<vmem>>, vector<16x80xf32>
    %c17 = arith.constant 17 : index
    %c0_74 = arith.constant 0 : index
    %101 = vector.load %arg2[%c17, %c0_74] : memref<25x80xf32, #tpu.memory_space<vmem>>, vector<1x80xf32>
    %102 = vector.broadcast %101 : vector<1x80xf32> to vector<16x80xf32>
    %103 = arith.mulf %100, %102 : vector<16x80xf32>
    %104 = arith.addf %99, %103 : vector<16x80xf32>
    %c3_75 = arith.constant 3 : index
    %c3_76 = arith.constant 3 : index
    %105 = vector.load %arg6[%c3_75, %c3_76] : memref<20x84xf32, #tpu.memory_space<vmem>>, vector<16x80xf32>
    %c18 = arith.constant 18 : index
    %c0_77 = arith.constant 0 : index
    %106 = vector.load %arg2[%c18, %c0_77] : memref<25x80xf32, #tpu.memory_space<vmem>>, vector<1x80xf32>
    %107 = vector.broadcast %106 : vector<1x80xf32> to vector<16x80xf32>
    %108 = arith.mulf %105, %107 : vector<16x80xf32>
    %109 = arith.addf %104, %108 : vector<16x80xf32>
    %c3_78 = arith.constant 3 : index
    %c4_79 = arith.constant 4 : index
    %110 = vector.load %arg6[%c3_78, %c4_79] : memref<20x84xf32, #tpu.memory_space<vmem>>, vector<16x80xf32>
    %c19 = arith.constant 19 : index
    %c0_80 = arith.constant 0 : index
    %111 = vector.load %arg2[%c19, %c0_80] : memref<25x80xf32, #tpu.memory_space<vmem>>, vector<1x80xf32>
    %112 = vector.broadcast %111 : vector<1x80xf32> to vector<16x80xf32>
    %113 = arith.mulf %110, %112 : vector<16x80xf32>
    %114 = arith.addf %109, %113 : vector<16x80xf32>
    %c4_81 = arith.constant 4 : index
    %c0_82 = arith.constant 0 : index
    %115 = vector.load %arg6[%c4_81, %c0_82] : memref<20x84xf32, #tpu.memory_space<vmem>>, vector<16x80xf32>
    %c20 = arith.constant 20 : index
    %c0_83 = arith.constant 0 : index
    %116 = vector.load %arg2[%c20, %c0_83] : memref<25x80xf32, #tpu.memory_space<vmem>>, vector<1x80xf32>
    %117 = vector.broadcast %116 : vector<1x80xf32> to vector<16x80xf32>
    %118 = arith.mulf %115, %117 : vector<16x80xf32>
    %119 = arith.addf %114, %118 : vector<16x80xf32>
    %c4_84 = arith.constant 4 : index
    %c1_85 = arith.constant 1 : index
    %120 = vector.load %arg6[%c4_84, %c1_85] : memref<20x84xf32, #tpu.memory_space<vmem>>, vector<16x80xf32>
    %c21 = arith.constant 21 : index
    %c0_86 = arith.constant 0 : index
    %121 = vector.load %arg2[%c21, %c0_86] : memref<25x80xf32, #tpu.memory_space<vmem>>, vector<1x80xf32>
    %122 = vector.broadcast %121 : vector<1x80xf32> to vector<16x80xf32>
    %123 = arith.mulf %120, %122 : vector<16x80xf32>
    %124 = arith.addf %119, %123 : vector<16x80xf32>
    %c4_87 = arith.constant 4 : index
    %c2_88 = arith.constant 2 : index
    %125 = vector.load %arg6[%c4_87, %c2_88] : memref<20x84xf32, #tpu.memory_space<vmem>>, vector<16x80xf32>
    %c22 = arith.constant 22 : index
    %c0_89 = arith.constant 0 : index
    %126 = vector.load %arg2[%c22, %c0_89] : memref<25x80xf32, #tpu.memory_space<vmem>>, vector<1x80xf32>
    %127 = vector.broadcast %126 : vector<1x80xf32> to vector<16x80xf32>
    %128 = arith.mulf %125, %127 : vector<16x80xf32>
    %129 = arith.addf %124, %128 : vector<16x80xf32>
    %c4_90 = arith.constant 4 : index
    %c3_91 = arith.constant 3 : index
    %130 = vector.load %arg6[%c4_90, %c3_91] : memref<20x84xf32, #tpu.memory_space<vmem>>, vector<16x80xf32>
    %c23 = arith.constant 23 : index
    %c0_92 = arith.constant 0 : index
    %131 = vector.load %arg2[%c23, %c0_92] : memref<25x80xf32, #tpu.memory_space<vmem>>, vector<1x80xf32>
    %132 = vector.broadcast %131 : vector<1x80xf32> to vector<16x80xf32>
    %133 = arith.mulf %130, %132 : vector<16x80xf32>
    %134 = arith.addf %129, %133 : vector<16x80xf32>
    %c4_93 = arith.constant 4 : index
    %c4_94 = arith.constant 4 : index
    %135 = vector.load %arg6[%c4_93, %c4_94] : memref<20x84xf32, #tpu.memory_space<vmem>>, vector<16x80xf32>
    %c24 = arith.constant 24 : index
    %c0_95 = arith.constant 0 : index
    %136 = vector.load %arg2[%c24, %c0_95] : memref<25x80xf32, #tpu.memory_space<vmem>>, vector<1x80xf32>
    %137 = vector.broadcast %136 : vector<1x80xf32> to vector<16x80xf32>
    %138 = arith.mulf %135, %137 : vector<16x80xf32>
    %139 = arith.addf %134, %138 : vector<16x80xf32>
    %cst_96 = arith.constant 0.000000e+00 : f32
    %140 = vector.broadcast %cst_96 : f32 to vector<16x128xf32>
    %141 = vector.extract_strided_slice %139 {offsets = [0, 0], sizes = [16, 16], strides = [1, 1]} : vector<16x80xf32> to vector<16x16xf32>
    %142 = tpu.concatenate %141, %141, %141, %141, %141, %141, %141, %141 in 1 : vector<16x16xf32>, vector<16x16xf32>, vector<16x16xf32>, vector<16x16xf32>, vector<16x16xf32>, vector<16x16xf32>, vector<16x16xf32>, vector<16x16xf32> -> vector<16x128xf32>
    %c0_97 = arith.constant 0 : index
    %c0_98 = arith.constant 0 : index
    %143 = vector.load %arg3[%c0_97, %c0_98] : memref<4x128xf32, #tpu.memory_space<vmem>>, vector<1x128xf32>
    %144 = vector.broadcast %143 : vector<1x128xf32> to vector<16x128xf32>
    %145 = arith.mulf %142, %144 : vector<16x128xf32>
    %146 = arith.addf %140, %145 : vector<16x128xf32>
    %147 = vector.extract_strided_slice %139 {offsets = [0, 20], sizes = [16, 16], strides = [1, 1]} : vector<16x80xf32> to vector<16x16xf32>
    %148 = tpu.concatenate %147, %147, %147, %147, %147, %147, %147, %147 in 1 : vector<16x16xf32>, vector<16x16xf32>, vector<16x16xf32>, vector<16x16xf32>, vector<16x16xf32>, vector<16x16xf32>, vector<16x16xf32>, vector<16x16xf32> -> vector<16x128xf32>
    %c1_99 = arith.constant 1 : index
    %c0_100 = arith.constant 0 : index
    %149 = vector.load %arg3[%c1_99, %c0_100] : memref<4x128xf32, #tpu.memory_space<vmem>>, vector<1x128xf32>
    %150 = vector.broadcast %149 : vector<1x128xf32> to vector<16x128xf32>
    %151 = arith.mulf %148, %150 : vector<16x128xf32>
    %152 = arith.addf %146, %151 : vector<16x128xf32>
    %153 = vector.extract_strided_slice %139 {offsets = [0, 40], sizes = [16, 16], strides = [1, 1]} : vector<16x80xf32> to vector<16x16xf32>
    %154 = tpu.concatenate %153, %153, %153, %153, %153, %153, %153, %153 in 1 : vector<16x16xf32>, vector<16x16xf32>, vector<16x16xf32>, vector<16x16xf32>, vector<16x16xf32>, vector<16x16xf32>, vector<16x16xf32>, vector<16x16xf32> -> vector<16x128xf32>
    %c2_101 = arith.constant 2 : index
    %c0_102 = arith.constant 0 : index
    %155 = vector.load %arg3[%c2_101, %c0_102] : memref<4x128xf32, #tpu.memory_space<vmem>>, vector<1x128xf32>
    %156 = vector.broadcast %155 : vector<1x128xf32> to vector<16x128xf32>
    %157 = arith.mulf %154, %156 : vector<16x128xf32>
    %158 = arith.addf %152, %157 : vector<16x128xf32>
    %159 = vector.extract_strided_slice %139 {offsets = [0, 60], sizes = [16, 16], strides = [1, 1]} : vector<16x80xf32> to vector<16x16xf32>
    %160 = tpu.concatenate %159, %159, %159, %159, %159, %159, %159, %159 in 1 : vector<16x16xf32>, vector<16x16xf32>, vector<16x16xf32>, vector<16x16xf32>, vector<16x16xf32>, vector<16x16xf32>, vector<16x16xf32>, vector<16x16xf32> -> vector<16x128xf32>
    %c3_103 = arith.constant 3 : index
    %c0_104 = arith.constant 0 : index
    %161 = vector.load %arg3[%c3_103, %c0_104] : memref<4x128xf32, #tpu.memory_space<vmem>>, vector<1x128xf32>
    %162 = vector.broadcast %161 : vector<1x128xf32> to vector<16x128xf32>
    %163 = arith.mulf %160, %162 : vector<16x128xf32>
    %164 = arith.addf %158, %163 : vector<16x128xf32>
    %c0_105 = arith.constant 0 : index
    %c0_106 = arith.constant 0 : index
    %165 = vector.load %arg4[%c0_105, %c0_106] : memref<1x128xf32, #tpu.memory_space<vmem>>, vector<1x128xf32>
    %166 = vector.broadcast %165 : vector<1x128xf32> to vector<16x128xf32>
    %167 = arith.addf %164, %166 : vector<16x128xf32>
    %cst_107 = arith.constant 0.000000e+00 : f32
    %168 = vector.broadcast %cst_107 : f32 to vector<16x128xf32>
    %169 = arith.maximumf %167, %168 : vector<16x128xf32>
    %c0_108 = arith.constant 0 : index
    %c0_109 = arith.constant 0 : index
    %c0_110 = arith.constant 0 : index
    %170 = vector.load %arg5[%c0_108, %c0_109, %c0_110] : memref<1x16x128xf32, #tpu.memory_space<vmem>>, vector<1x16x128xf32>
    %171 = vector.shape_cast %170 : vector<1x16x128xf32> to vector<16x128xf32>
    %172 = vector.shape_cast %169 : vector<16x128xf32> to vector<1x16x128xf32>
    tpu.vector_store %arg5[%c0_108, %c0_109, %c0_110], %172 {strides = array<i32>} : memref<1x16x128xf32, #tpu.memory_space<vmem>>, vector<1x16x128xf32>,
    return
  }
  func.func @transform_0(%arg0: i32) -> (i32, i32, i32, i32) {
    %c0_i32 = arith.constant 0 : i32
    %c0_i32_0 = arith.constant 0 : i32
    %c0_i32_1 = arith.constant 0 : i32
    %c0_i32_2 = arith.constant 0 : i32
    return %arg0, %c0_i32, %c0_i32_0, %c0_i32_1 : i32, i32, i32, i32
  }
  func.func @transform_1(%arg0: i32) -> (i32, i32) {
    %c0_i32 = arith.constant 0 : i32
    %c0_i32_0 = arith.constant 0 : i32
    %c0_i32_1 = arith.constant 0 : i32
    return %c0_i32, %c0_i32_0 : i32, i32
  }
  func.func @transform_2(%arg0: i32) -> (i32, i32) {
    %c0_i32 = arith.constant 0 : i32
    %c0_i32_0 = arith.constant 0 : i32
    %c0_i32_1 = arith.constant 0 : i32
    return %c0_i32, %c0_i32_0 : i32, i32
  }
  func.func @transform_3(%arg0: i32) -> (i32, i32) {
    %c0_i32 = arith.constant 0 : i32
    %c0_i32_0 = arith.constant 0 : i32
    %c0_i32_1 = arith.constant 0 : i32
    return %c0_i32, %c0_i32_0 : i32, i32
  }
  func.func @transform_4(%arg0: i32) -> (i32, i32, i32) {
    %c0_i32 = arith.constant 0 : i32
    %c0_i32_0 = arith.constant 0 : i32
    %c0_i32_1 = arith.constant 0 : i32
    return %arg0, %c0_i32, %c0_i32_0 : i32, i32, i32
  }
}

</mosaic_0001>

<bundles_post_ra>
// kernel: tpu_custom_call.1
= control target key start
LH: loop header
LB: loop body
LE: loop exit
PB: predicated region body
PF: predicated region fallthrough
CT: control target
= control target key end

     0   :  { %9 = vsyncpa [#allocation4], 0  ;;  %s2075_s0 = inlined_call_operand.hbm [shape: f32[2,4,16,16], index: 0, kind: input, shape index: {}]   ;;  %s2076_s1 = inlined_call_operand.hbm [shape: f32[25,80], index: 1, kind: input, shape index: {}]   ;;  %s2077_s2 = inlined_call_operand.hbm [shape: f32[4,128], index: 2, kind: input, shape index: {}]   ;;  %s2078_s3 = inlined_call_operand.vmem [shape: f32[1,128], index: 3, kind: input, shape index: {}]   ;;  %s2079_s4 = inlined_call_operand.hbm [shape: f32[2,16,128], index: 4, kind: output, shape index: {}]  }
   0x1   :  { %11 = vsyncpa [#allocation4 + $0x1], 0 }
   0x2   :  { %12 = vsyncpa [#allocation7], 0 }
   0x3   :  { %13 = vsyncpa [#allocation5], 0 }
   0x4   :  { %15 = vsyncpa [#allocation5 + $0x1], 0  ;;  %s1606_s15 = smov 0   ;;  %s1608_s16 = smov 0  }
   0x5   :  { %s1610_s17 = smov 0   ;;  %s1612_s18 = smov 0  }
   0x6 LB: > { %s1627_s19 = sadd.s32 4294967295, %s1532_s18   ;;  %s1218_s20 = sadd.s32 4294967294, %s1532_s18   ;;  %s1532_s18 = sphi %s1612_s18, %s2100_s18   ;;  %s1528_s17 = sphi %s1610_s17, %s2099_s17   ;;  %s1524_s16 = sphi %s1608_s16, %s2098_s16   ;;  %s1520_s15 = sphi %s1606_s15, %s2097_s15  }
   0x7   : > { %p41_p0 = scmp.ne.s32.totalorder %s1524_s16, %s1520_s15  ;;  %p2080_p1 = scmp.eq.s32.totalorder %s1627_s19, 0 }
   0x8   : > { %p128_p2 = scmp.eq.s32.totalorder %s1627_s19, 1  ;;  %p134_p3 = scmp.eq.s32.totalorder %s1218_s20, 1 }
   0x9   : > { %p1636_p4 = por %p2080_p1, %p41_p0  ;;  %p1219_p5 = scmp.ge.s32.totalorder %s1532_s18, 1 }
   0xa   : > { %p1641_p6 = por %p134_p3, %p41_p0  ;;  %p141_p7 = scmp.lt.s32.totalorder %s1532_s18, 3 }
   0xb   : > { %s2084_s21 = scalar_select %p1636_p4, 1, 0 }
   0xc   : > { %s2085_s22 = scalar_select %p1641_p6, 1, 0 }
   0xd   : > { %p1646_p8 = pnand %p1219_p5, %p141_p7  ;;  %s1534_s24 = smov [#allocation6]  }
   0xe   : > { %s153_s25 = sshll.u32 %s1534_s24, 4  ;;  %s1535_s27 = smov [#allocation8]   ;;  %s154_s25 = int_to_ptr.vmem [resolvable:$true] %s153_s25 }
   0xf   : > { %s2086_s23 = scalar_select %p1646_p8, 1, 0 }
  0x10   : > { %p1286_p9 = pneg %p1646_p8  ;;  %s167_s28 = sshll.u32 %s1535_s27, 4  ;;  %s168_s28 = int_to_ptr.vmem [resolvable:$true] %s167_s28 }
  0x11   : > { %s1395_s29 = scalar_lea.vmem %s154_s25, 512  ;;  %p1403_p5 = scmp.lt.s32.totalorder %s154_s25, %s154_s25 }
  0x12   : > { %p1655_p11 = pnand %p1286_p9, %p2080_p1  ;;  %p1396_p13 = scmp.ne.s32.totalorder %s154_s25, %s1395_s29 }
  0x13   : > { %p1404_p7 = scmp.lt.s32.totalorder %s1395_s29, %s1395_s29 }
  0x14   : > { %p1386_p12 = pneg %p1655_p11 }
  0x15   : > { %p1405_p10 = por %p1404_p7, %p1403_p5 }
  0x16   : > { %p1398_p0 = pnand %p1396_p13, %p1386_p12 }
  0x18   : > { %p1399_p3 = pneg %p1398_p0 }
  0x1a   : > { %p1406_p9 = pnand %p1405_p10, %p1399_p3 }
  0x1c   : > { %1409 = shalt.err (!%p1406_p9)
}
  0x1d   : > { %s1536_s30 = smov 128   ;;  %s1537_s5 = smov 8  }
  0x1e   : > { %1289 = dma.hbm_to_vmem [thread:$0]  (!%p1655_p11), %s2076_s1, 512, %s154_s25, [#allocation7], %s1536_s30, %s1536_s30, %s1537_s5  }
  0x1f   : > { %s1421_s8 = scalar_lea.vmem %s168_s28, 64  ;;  %p1429_p10 = scmp.lt.s32.totalorder %s168_s28, %s168_s28 }
  0x20   : > { %p1422_p13 = scmp.ne.s32.totalorder %s168_s28, %s1421_s8  ;;  %p1430_p3 = scmp.lt.s32.totalorder %s1421_s8, %s1421_s8 }
  0x22   : > { %p1424_p0 = pnand %p1422_p13, %p1386_p12  ;;  %p1431_p7 = por %p1430_p3, %p1429_p10 }
  0x24   : > { %p1425_p5 = pneg %p1424_p0 }
  0x26   : > { %p1432_p9 = pnand %p1431_p7, %p1425_p5 }
  0x28   : > { %1435 = shalt.err (!%p1432_p9)
}
  0x29   : > { %1292 = dma.hbm_to_vmem [thread:$0]  (!%p1655_p11), %s2077_s2, 64, %s168_s28, [#allocation7]  }
  0x2a   : > { %s1681_s11 = sadd.s32 1, %s1532_s18   ;;  %s28_s12 = sadd.s32 1, %s1528_s17 }
  0x2b   : > { %s25_s13 = ssub.s32 %s1532_s18, %s1681_s11  ;;  %p35_p12 = scmp.ne.s32.totalorder %s1528_s17, %s1524_s16 }
  0x2c   : > { %p26_p13 = scmp.eq.s32.totalorder %s25_s13, 0  ;;  %p36_p0 = scmp.eq.s32.totalorder %s1532_s18, 0 }
  0x2d   : > { %p1691_p5 = por %p128_p2, %p35_p12  ;;  %p1303_p10 = scmp.lt.s32.totalorder %s1532_s18, 2 }
  0x2e   : > { %s1697_s20 = scalar_select %p26_p13, %s1528_s17, %s28_s12  }
  0x2f   : > { %s2088_s14 = scalar_select %p1691_p5, 1, 0 }
  0x30   : > { %p37_p3 = por %p36_p0, %p35_p12  ;;  %s181_s24 = sand.u32 1, %s1528_s17  }
  0x31   : > { %s1223_s25 = sshll.u32 %s181_s24, 6  ;;  %s1272_s26 = sshll.u32 %s1532_s18, 10 }
  0x32   : > { %s1704_s29 = scalar_lea.hbm %s2075_s0, %s1272_s26  ;;  %s185_s6 = scalar_lea.vmem [#allocation3], %s1223_s25 }
  0x33   : > { %s192_s7 = sshll.u32 %s185_s6, 4  ;;  %p1708_p2 = pnand %p1303_p10, %p37_p3  ;;  %s1706_s7 = int_to_ptr.vmem [resolvable:$true] %s192_s7 }
  0x34   : > { %s1712_s9 = scalar_lea.sflag [#allocation4], %s181_s24  ;;  %s1436_s10 = scalar_lea.hbm %s1704_s29, 1024 }
  0x35   : > { %p1437_p11 = scmp.ne.s32.totalorder %s1704_s29, %s1436_s10  ;;  %p1438_p7 = pneg %p1708_p2 }
  0x36   : > { %s1441_s25 = scalar_lea.hbm %s2075_s0, 2048  ;;  %p1442_p13 = scmp.lt.s32.totalorder %s1704_s29, %s2075_s0 }
  0x37   : > { %p1439_p9 = pnand %p1438_p7, %p1437_p11  ;;  %p1443_p0 = scmp.lt.s32.totalorder %s1441_s25, %s1436_s10 }
  0x39   : > { %p1440_p12 = pneg %p1439_p9  ;;  %p1444_p10 = por %p1443_p0, %p1442_p13 }
  0x3b   : > { %p1445_p3 = pnand %p1444_p10, %p1440_p12 }
  0x3d   : > { %1448 = shalt.err (!%p1445_p3)
}
  0x3e   : > { %s1449_s24 = scalar_lea.vmem %s1706_s7, 1024  ;;  %s1538_s28 = smov [#allocation3]  }
  0x3f   : > { %p1450_p1 = scmp.ne.s32.totalorder %s1706_s7, %s1449_s24  ;;  %s1454_s6 = sshll.u32 %s1538_s28, 4  ;;  %s1455_s6 = int_to_ptr.vmem [resolvable:$false] %s1454_s6 }
  0x40   : > { %s1456_s12 = scalar_lea.vmem %s1455_s6, 2048  ;;  %p1457_p9 = scmp.lt.s32.totalorder %s1706_s7, %s1455_s6 }
  0x41   : > { %p1452_p6 = pnand %p1450_p1, %p1438_p7  ;;  %p1458_p5 = scmp.lt.s32.totalorder %s1456_s12, %s1449_s24 }
  0x43   : > { %p1453_p11 = pneg %p1452_p6  ;;  %p1459_p4 = por %p1458_p5, %p1457_p9 }
  0x45   : > { %p1460_p8 = pnand %p1459_p4, %p1453_p11 }
  0x47   : > { %1463 = shalt.err (!%p1460_p8)
}
  0x48   : > { %1296 = dma.hbm_to_vmem [thread:$0]  (!%p1708_p2), %s1704_s29, 1024, %s1706_s7, %s1712_s9, %s1536_s30, %s1536_s30, %s1537_s5  }
  0x49   : > { %p2090_p1 = scmp.ne.s32.totalorder %s2086_s23, 0 }
  0x4a   : > { %s1739_s10 = sand.u32 (!%p2090_p1), 1, %s1524_s16   ;;  %p2091_p4 = scmp.ne.s32.totalorder (!%p2090_p1), %s2084_s21, 0 }
  0x4b   : > { %204 = sbr.rel (%p2090_p1) target bundleno = 681 (0x2a9), region = 36  ;;  %s1227_s13 = sshll.u32 (!%p2090_p1), %s1739_s10, 6 }
  0x4c   : > { %s207_s25 = scalar_lea.sflag (!%p2090_p1), [#allocation4], %s1739_s10  ;;  %s210_s26 = scalar_lea.vmem (!%p2090_p1), [#allocation3], %s1227_s13 }
  0x50   : > { %1507 = dma.done.wait (%p2091_p4), %s207_s25, 1024  }
  0x51   : > { %1509 = vsyncadd (%p2091_p4), %s207_s25, 4294966272  ;;  %p2092_p6 = scmp.eq.s32.totalorder %s1627_s19, 0 }
  0x53   : > { %1511 = dma.done.wait (%p2092_p6), [#allocation7], 576   ;;  %p2093_p8 = pmov %p2092_p6 }
  0x54   : > { %v1231_v0 = vld [vmem:[%s210_s26 + $0x10] sm:$0xff]  ;;  %v243_v1 = vld [vmem:[%s210_s26] sm:$0xff]  ;;  %s1539_s23 = smov 22   ;;  %s1540_s30 = smov 2   ;;  %v1232_v2 = vld [vmem:[%s210_s26 + $0x18] sm:$0xff]  ;;  %vm286_vm0 = vcmask 15360  }
  0x55   : > { %1513 = vsyncadd (%p2093_p8), [#allocation7], 4294966720  ;;  %264 = vrot.lane.b32.xlu1 %v1231_v0, %s1539_s23  ;;  %256 = vrot.lane.b32.xlu0 %v243_v1, %s1540_s30  ;;  %v244_v3 = vld [vmem:[%s210_s26 + $0x8] sm:$0xff]  ;;  %v1233_v5 = vld [vmem:[%s210_s26 + $0x20] sm:$0xff]  ;;  %s1541_s21 = smov 42   ;;  %s1542_s5 = smov 62  }
  0x56   : > { %v1234_v4 = vld [vmem:[%s210_s26 + $0x28] sm:$0xff]  ;;  %v1236_v6 = vld [vmem:[%s210_s26 + $0x38] sm:$0xff]  ;;  %v1235_v7 = vld [vmem:[%s210_s26 + $0x30] sm:$0xff]  ;;  %s1543_s29 = smov 1   ;;  %s1544_s7 = smov 4   ;;  %vm289_vm1 = vcmask 146432  }
  0x57   : > { %v1239_v8 = vld [vmem:[#allocation6 + $0x2] ss:$0 sm:$0xff]  ;;  %v1238_v9 = vld [vmem:[#allocation6 + $0x1] ss:$0 sm:$0xff]  ;;  %v1241_v10 = vld [vmem:[#allocation6 + $0x4] ss:$0 sm:$0xff] }
  0x58   : > { %v1240_v11 = vld [vmem:[#allocation6 + $0x3] ss:$0 sm:$0xff]  ;;  %s1545_s8 = smov 3   ;;  %v1243_v12 = vld [vmem:[#allocation6 + $0x6] ss:$0 sm:$0xff]  ;;  %vm292_vm2 = vcmask 162816  }
  0x59   : > { %266 = vrot.lane.b32.xlu1 %v1232_v2, %s1539_s23  ;;  %258 = vrot.lane.b32.xlu0 %v244_v3, %s1540_s30  ;;  %v1244_v13 = vld [vmem:[#allocation6 + $0x7] ss:$0 sm:$0xff]  ;;  %v1245_v14 = vld [vmem:[#allocation6 + $0x8] ss:$0 sm:$0xff]  ;;  %v1246_v15 = vld [vmem:[#allocation6 + $0x9] ss:$0 sm:$0xff] }
  0x5a   : > { %v1249_v16 = vld [vmem:[#allocation6 + $0xc] ss:$0 sm:$0xff]  ;;  %v1248_v17 = vld [vmem:[#allocation6 + $0xb] ss:$0 sm:$0xff]  ;;  %v1251_v18 = vld [vmem:[#allocation6 + $0xe] ss:$0 sm:$0xff] }
  0x5b   : > { %v1250_v19 = vld [vmem:[#allocation6 + $0xd] ss:$0 sm:$0xff]  ;;  %v1253_v20 = vld [vmem:[#allocation6 + $0x10] ss:$0 sm:$0xff]  ;;  %v1254_v21 = vld [vmem:[#allocation6 + $0x11] ss:$0 sm:$0xff] }
  0x5c   : > { %v1255_v22 = vld [vmem:[#allocation6 + $0x12] ss:$0 sm:$0xff]  ;;  %v1256_v23 = vld [vmem:[#allocation6 + $0x13] ss:$0 sm:$0xff]  ;;  %v1259_v24 = vld [vmem:[#allocation6 + $0x16] ss:$0 sm:$0xff] }
  0x5d   : > { %274 = vrot.lane.b32.xlu1 %v1234_v4, %s1541_s21  ;;  %272 = vrot.lane.b32.xlu0 %v1233_v5, %s1541_s21  ;;  %v1258_v25 = vld [vmem:[#allocation6 + $0x15] ss:$0 sm:$0xff]  ;;  %v1261_v26 = vld [vmem:[#allocation6 + $0x18] ss:$0 sm:$0xff]  ;;  %v1260_v27 = vld [vmem:[#allocation6 + $0x17] ss:$0 sm:$0xff] }
  0x5e   : > { %vm295_vm3 = vcmask 179200   ;;  %vm298_vm4 = vcmask 310272   ;;  %vm301_vm5 = vcmask 326656   ;;  %vm304_vm6 = vcmask 343040   ;;  %s1546_s9 = smov 127   ;;  %s1547_s27 = smov 126  }
  0x5f   : > { %vm307_vm7 = vcmask 474112   ;;  %vm310_vm8 = vcmask 490496   ;;  %vm313_vm9 = vcmask 506880   ;;  %vm316_vm10 = vcmask 637952   ;;  %s1548_s24 = smov 125   ;;  %s1549_s28 = smov 124  }
  0x60   : > { %vm319_vm11 = vcmask 654336   ;;  %vm324_vm12 = vcmask 1041408   ;;  %vm333_vm13 = vcmask 687104   ;;  %vm336_vm14 = vcmask 683008   ;;  %s1550_s6 = smov 16   ;;  %s1551_s12 = smov 32  }
  0x61   : > { %282 = vrot.lane.b32.xlu1 %v1236_v6, %s1542_s5  ;;  %280 = vrot.lane.b32.xlu0 %v1235_v7, %s1542_s5  ;;  %s1552_s13 = smov 48   ;;  %s1553_s25 = smov 64   ;;  %vm857_vm15 = vcmask 130048  }
  0x62   : > { %s1554_s26 = smov 80   ;;  %s1555_s23 = smov 96  }
  0x63   : > { %s1557_s21 = smov 108   ;;  %s1558_s5 = smov 12  }
  0x64   : > { %p2094_p2 = scmp.ne.s32.totalorder %s2088_s14, 0 }
  0x65   : > { %376 = vrot.lane.b32.xlu1 %v1239_v8, %s1540_s30  ;;  %355 = vrot.lane.b32.xlu0 %v1238_v9, %s1543_s29 }
  0x69   : > { %418 = vrot.lane.b32.xlu1 %v1241_v10, %s1544_s7  ;;  %397 = vrot.lane.b32.xlu0 %v1240_v11, %s1545_s8 }
  0x6d   : > { %450 = vrot.lane.b32.xlu1 %v1243_v12, %s1543_s29  ;;  %471 = vrot.lane.b32.xlu0 %v1244_v13, %s1540_s30 }
  0x71   : > { %492 = vrot.lane.b32.xlu1 %v1245_v14, %s1545_s8  ;;  %513 = vrot.lane.b32.xlu0 %v1246_v15, %s1544_s7 }
  0x75   : > { %566 = vrot.lane.b32.xlu1 %v1249_v16, %s1540_s30  ;;  %545 = vrot.lane.b32.xlu0 %v1248_v17, %s1543_s29 }
  0x79   : > { %608 = vrot.lane.b32.xlu1 %v1251_v18, %s1544_s7  ;;  %587 = vrot.lane.b32.xlu0 %v1250_v19, %s1545_s8 }
  0x7d   : > { %640 = vrot.lane.b32.xlu1 %v1253_v20, %s1543_s29  ;;  %661 = vrot.lane.b32.xlu0 %v1254_v21, %s1540_s30 }
  0x81   : > { %682 = vrot.lane.b32.xlu1 %v1255_v22, %s1545_s8  ;;  %703 = vrot.lane.b32.xlu0 %v1256_v23, %s1544_s7 }
  0x85   : > { %756 = vrot.lane.b32.xlu1 %v1259_v24, %s1540_s30  ;;  %735 = vrot.lane.b32.xlu0 %v1258_v25, %s1543_s29  ;;  %s1556_s30 = smov 112   ;;  %s1559_s29 = smov 28  }
  0x89   : > { %798 = vrot.lane.b32.xlu1 %v1261_v26, %s1544_s7  ;;  %777 = vrot.lane.b32.xlu0 %v1260_v27, %s1545_s8  ;;  %s1560_s8 = smov 44  }
  0xc7   : > { %v265_v28 = vpop.permute.xlu1 %264  ;;  %v257_v29 = vpop.permute.xlu0 %256 }
  0xc8   : > { %v287_v30 = vsel %vm286_vm0, 0.0, %v257_v29 }
  0xc9   : > { %v290_v31 = vsel %vm289_vm1, %v287_v30, 0.0 }
  0xca   : > { %v293_v32 = vsel %vm292_vm2, %v290_v31, 0.0 }
  0xcb   : > { %v267_v33 = vpop.permute.xlu1 %266  ;;  %v259_v34 = vpop.permute.xlu0 %258  ;;  %v296_v35 = vsel %vm295_vm3, %v293_v32, %v265_v28 }
  0xcc   : > { %v288_v36 = vsel %vm286_vm0, 0.0, %v259_v34  ;;  %v299_v37 = vsel %vm298_vm4, %v296_v35, 0.0  ;;  %vm860_vm0 = vcmask 261120  }
  0xcd   : > { %v291_v38 = vsel %vm289_vm1, %v288_v36, 0.0  ;;  %v302_v42 = vsel %vm301_vm5, %v299_v37, 0.0  ;;  %vm863_vm1 = vcmask 392192  }
  0xce   : > { %v294_v39 = vsel %vm292_vm2, %v291_v38, 0.0  ;;  %vm866_vm2 = vcmask 523264  }
  0xcf   : > { %v275_v40 = vpop.permute.xlu1 %274  ;;  %v297_v41 = vsel %vm295_vm3, %v294_v39, %v267_v33  ;;  %v273_v43 = vpop.permute.xlu0 %272  ;;  %vm871_vm3 = vcmask 785408  }
  0xd0   : > { %v300_v44 = vsel %vm298_vm4, %v297_v41, 0.0  ;;  %v305_v45 = vsel %vm304_vm6, %v302_v42, %v273_v43  ;;  %vm874_vm4 = vcmask 916480  }
  0xd1   : > { %v303_v46 = vsel %vm301_vm5, %v300_v44, 0.0  ;;  %v308_v47 = vsel %vm307_vm7, %v305_v45, 0.0 }
  0xd2   : > { %v306_v48 = vsel %vm304_vm6, %v303_v46, %v275_v40  ;;  %v311_v49 = vsel %vm310_vm8, %v308_v47, 0.0 }
  0xd3   : > { %v309_v50 = vsel %vm307_vm7, %v306_v48, 0.0  ;;  %v283_v51 = vpop.permute.xlu1 %282  ;;  %v281_v52 = vpop.permute.xlu0 %280 }
  0xd4   : > { %v312_v53 = vsel %vm310_vm8, %v309_v50, 0.0  ;;  %v314_v54 = vsel %vm313_vm9, %v311_v49, %v281_v52 }
  0xd5   : > { %v315_v55 = vsel %vm313_vm9, %v312_v53, %v283_v51  ;;  %v317_v56 = vsel %vm316_vm10, %v314_v54, 0.0 }
  0xd6   : > { %v318_v57 = vsel %vm316_vm10, %v315_v55, 0.0  ;;  %v320_v58 = vsel %vm319_vm11, %v317_v56, 0.0 }
  0xd7   : > { %v321_v59 = vsel %vm319_vm11, %v318_v57, 0.0  ;;  %v325_v60 = vrot.slane %v320_v58, 6  ;;  %v356_v2 = vpop.permute.xlu0 %355  ;;  %v377_v6 = vpop.permute.xlu1 %376 }
  0xd8   : > { %v326_v61 = vrot.slane %v321_v59, 6 }
  0xd9   : > { %v331_v62 = vsel %vm324_vm12, 0.0, %v325_v60 }
  0xda   : > { %v332_v63 = vsel %vm324_vm12, %v326_v61, 0.0  ;;  %v327_v0 = vsel %vm324_vm12, %v325_v60, %v326_v61  ;;  %334 = vst.msk [vmem:[#allocation2] sm:$0xff] %vm333_vm13, %v331_v62 }
  0xdb   : > { %337 = vst.msk [vmem:[#allocation2 + $0x10] sm:$0xf] %vm336_vm14, %v332_v63  ;;  %v398_v9 = vpop.permute.xlu0 %397  ;;  %v419_v11 = vpop.permute.xlu1 %418 }
  0xdc   : > { %335 = vst.msk [vmem:[#allocation2 + $0x8] sm:$0xff] %vm333_vm13, %v327_v0 }
  0xdf   : > { %v451_v17 = vpop.permute.xlu1 %450  ;;  %v472_v20 = vpop.permute.xlu0 %471 }
  0xe1   : > { %v1781_v1 = vld [vmem:[#allocation2] sm:$0xff] }
  0xe2   : > { %v358_v4 = vmul.f32 %v356_v2, %v1781_v1  ;;  %v379_v7 = vmul.f32 %v377_v6, %v1781_v1  ;;  %v400_v10 = vmul.f32 %v398_v9, %v1781_v1  ;;  %v421_v13 = vmul.f32 %v419_v11, %v1781_v1 }
  0xe3   : > { %v1783_v3 = vld [vmem:[#allocation2 + $0x8] sm:$0xff]  ;;  %v493_v23 = vpop.permute.xlu1 %492  ;;  %v514_v24 = vpop.permute.xlu0 %513 }
  0xe4   : > { %v359_v5 = vmul.f32 %v356_v2, %v1783_v3  ;;  %362 = vrot.lane.b32.xlu0 %v358_v4, %s1546_s9  ;;  %v380_v8 = vmul.f32 %v377_v6, %v1783_v3  ;;  %v401_v12 = vmul.f32 %v398_v9, %v1783_v3  ;;  %v422_v14 = vmul.f32 %v419_v11, %v1783_v3  ;;  %v1799_v15 = vld [vmem:[#allocation2 + $0x1] sm:$0xff]  ;;  %v1801_v16 = vld [vmem:[#allocation2 + $0x9] sm:$0xff]  ;;  %v1237_v11 = vld [vmem:[#allocation6] ss:$0 sm:$0xff] }
  0xe5   : > { %v453_v18 = vmul.f32 %v451_v17, %v1799_v15  ;;  %v454_v19 = vmul.f32 %v451_v17, %v1801_v16  ;;  %v474_v21 = vmul.f32 %v472_v20, %v1799_v15  ;;  %v475_v22 = vmul.f32 %v472_v20, %v1801_v16  ;;  %v1820_v30 = vld [vmem:[#allocation2 + $0x2] sm:$0xff]  ;;  %v1823_v31 = vld [vmem:[#allocation2 + $0xa] sm:$0xff] }
  0xe6   : > { %364 = vrot.lane.b32.xlu1 %v359_v5, %s1546_s9  ;;  %v495_v25 = vmul.f32 %v493_v23, %v1799_v15  ;;  %v496_v26 = vmul.f32 %v493_v23, %v1801_v16  ;;  %v516_v27 = vmul.f32 %v514_v24, %v1799_v15  ;;  %v517_v28 = vmul.f32 %v514_v24, %v1801_v16  ;;  %v1840_v44 = vld [vmem:[#allocation2 + $0x3] sm:$0xff]  ;;  %v1843_v45 = vld [vmem:[#allocation2 + $0xb] sm:$0xff]  ;;  %v1242_v24 = vld [vmem:[#allocation6 + $0x5] ss:$0 sm:$0xff] }
  0xe7   : > { %v546_v29 = vpop.permute.xlu0 %545  ;;  %v567_v33 = vpop.permute.xlu1 %566  ;;  %v1860_v58 = vld [vmem:[#allocation2 + $0x4] sm:$0xff]  ;;  %v1863_v59 = vld [vmem:[#allocation2 + $0xc] sm:$0xff]  ;;  %v346_v17 = vmul.f32 %v1237_v11, %v1783_v3 }
  0xe8   : > { %383 = vrot.lane.b32.xlu0 %v379_v7, %s1547_s27  ;;  %v548_v32 = vmul.f32 %v546_v29, %v1820_v30  ;;  %v549_v34 = vmul.f32 %v546_v29, %v1823_v31  ;;  %v569_v35 = vmul.f32 %v567_v33, %v1820_v30  ;;  %v570_v36 = vmul.f32 %v567_v33, %v1823_v31 }
  0xea   : > { %385 = vrot.lane.b32.xlu1 %v380_v8, %s1547_s27 }
  0xeb   : > { %v588_v37 = vpop.permute.xlu0 %587  ;;  %v609_v38 = vpop.permute.xlu1 %608 }
  0xec   : > { %404 = vrot.lane.b32.xlu0 %v400_v10, %s1548_s24  ;;  %v590_v39 = vmul.f32 %v588_v37, %v1820_v30  ;;  %v591_v40 = vmul.f32 %v588_v37, %v1823_v31  ;;  %v611_v41 = vmul.f32 %v609_v38, %v1820_v30  ;;  %v612_v42 = vmul.f32 %v609_v38, %v1823_v31 }
  0xee   : > { %406 = vrot.lane.b32.xlu1 %v401_v12, %s1548_s24 }
  0xef   : > { %v641_v43 = vpop.permute.xlu1 %640  ;;  %v662_v48 = vpop.permute.xlu0 %661 }
  0xf0   : > { %425 = vrot.lane.b32.xlu0 %v421_v13, %s1549_s28  ;;  %v643_v46 = vmul.f32 %v641_v43, %v1840_v44  ;;  %v644_v47 = vmul.f32 %v641_v43, %v1843_v45  ;;  %v664_v49 = vmul.f32 %v662_v48, %v1840_v44  ;;  %v665_v50 = vmul.f32 %v662_v48, %v1843_v45 }
  0xf1   : > { %v345_v13 = vmul.f32 %v1237_v11, %v1781_v1  ;;  %v441_v1 = vmul.f32 %v1242_v24, %v1801_v16 }
  0xf2   : > { %427 = vrot.lane.b32.xlu1 %v422_v14, %s1549_s28 }
  0xf3   : > { %v683_v51 = vpop.permute.xlu1 %682  ;;  %v704_v52 = vpop.permute.xlu0 %703 }
  0xf4   : > { %457 = vrot.lane.b32.xlu0 %v453_v18, %s1546_s9  ;;  %v685_v53 = vmul.f32 %v683_v51, %v1840_v44  ;;  %v686_v54 = vmul.f32 %v683_v51, %v1843_v45  ;;  %v706_v55 = vmul.f32 %v704_v52, %v1840_v44  ;;  %v707_v56 = vmul.f32 %v704_v52, %v1843_v45 }
  0xf6   : > { %459 = vrot.lane.b32.xlu1 %v454_v19, %s1546_s9 }
  0xf7   : > { %v736_v57 = vpop.permute.xlu0 %735  ;;  %v757_v61 = vpop.permute.xlu1 %756 }
  0xf8   : > { %478 = vrot.lane.b32.xlu0 %v474_v21, %s1547_s27  ;;  %v738_v60 = vmul.f32 %v736_v57, %v1860_v58  ;;  %v739_v62 = vmul.f32 %v736_v57, %v1863_v59  ;;  %v759_v63 = vmul.f32 %v757_v61, %v1860_v58  ;;  %v760_v0 = vmul.f32 %v757_v61, %v1863_v59 }
  0xfa   : > { %480 = vrot.lane.b32.xlu1 %v475_v22, %s1547_s27 }
  0xfb   : > { %v778_v2 = vpop.permute.xlu0 %777  ;;  %v799_v5 = vpop.permute.xlu1 %798 }
  0xfc   : > { %499 = vrot.lane.b32.xlu0 %v495_v25, %s1548_s24  ;;  %v780_v4 = vmul.f32 %v778_v2, %v1860_v58  ;;  %v781_v6 = vmul.f32 %v778_v2, %v1863_v59  ;;  %v801_v7 = vmul.f32 %v799_v5, %v1860_v58  ;;  %v802_v8 = vmul.f32 %v799_v5, %v1863_v59 }
  0xfe   : > { %501 = vrot.lane.b32.xlu1 %v496_v26, %s1548_s24 }
 0x100   : > { %520 = vrot.lane.b32.xlu0 %v516_v27, %s1549_s28 }
 0x102   : > { %522 = vrot.lane.b32.xlu1 %v517_v28, %s1549_s28 }
 0x104   : > { %552 = vrot.lane.b32.xlu0 %v548_v32, %s1546_s9  ;;  %v440_v32 = vmul.f32 %v1242_v24, %v1799_v15 }
 0x106   : > { %554 = vrot.lane.b32.xlu1 %v549_v34, %s1546_s9 }
 0x108   : > { %573 = vrot.lane.b32.xlu0 %v569_v35, %s1547_s27 }
 0x10a   : > { %575 = vrot.lane.b32.xlu1 %v570_v36, %s1547_s27 }
 0x10c   : > { %594 = vrot.lane.b32.xlu0 %v590_v39, %s1548_s24 }
 0x10e   : > { %596 = vrot.lane.b32.xlu1 %v591_v40, %s1548_s24 }
 0x110   : > { %615 = vrot.lane.b32.xlu0 %v611_v41, %s1549_s28 }
 0x112   : > { %617 = vrot.lane.b32.xlu1 %v612_v42, %s1549_s28 }
 0x114   : > { %647 = vrot.lane.b32.xlu0 %v643_v46, %s1546_s9 }
 0x116   : > { %649 = vrot.lane.b32.xlu1 %v644_v47, %s1546_s9  ;;  %v1247_v47 = vld [vmem:[#allocation6 + $0xa] ss:$0 sm:$0xff] }
 0x117   : > { %v535_v16 = vmul.f32 %v1247_v47, %v1820_v30 }
 0x118   : > { %668 = vrot.lane.b32.xlu0 %v664_v49, %s1547_s27 }
 0x11a   : > { %670 = vrot.lane.b32.xlu1 %v665_v50, %s1547_s27 }
 0x11c   : > { %689 = vrot.lane.b32.xlu0 %v685_v53, %s1548_s24  ;;  %v536_v53 = vmul.f32 %v1247_v47, %v1823_v31 }
 0x11e   : > { %691 = vrot.lane.b32.xlu1 %v686_v54, %s1548_s24 }
 0x120   : > { %710 = vrot.lane.b32.xlu0 %v706_v55, %s1549_s28 }
 0x122   : > { %712 = vrot.lane.b32.xlu1 %v707_v56, %s1549_s28 }
 0x124   : > { %742 = vrot.lane.b32.xlu0 %v738_v60, %s1546_s9 }
 0x126   : > { %744 = vrot.lane.b32.xlu1 %v739_v62, %s1546_s9  ;;  %s1561_s9 = smov 88  }
 0x128   : > { %763 = vrot.lane.b32.xlu0 %v759_v63, %s1547_s27 }
 0x12a   : > { %765 = vrot.lane.b32.xlu1 %v760_v0, %s1547_s27  ;;  %s1562_s27 = smov 104  }
 0x12c   : > { %784 = vrot.lane.b32.xlu0 %v780_v4, %s1548_s24 }
 0x12e   : > { %786 = vrot.lane.b32.xlu1 %v781_v6, %s1548_s24  ;;  %v1252_v6 = vld [vmem:[#allocation6 + $0xf] ss:$0 sm:$0xff]  ;;  %s1563_s24 = smov 120  }
 0x12f   : > { %v630_v31 = vmul.f32 %v1252_v6, %v1840_v44 }
 0x130   : > { %805 = vrot.lane.b32.xlu0 %v801_v7, %s1549_s28 }
 0x132   : > { %807 = vrot.lane.b32.xlu1 %v802_v8, %s1549_s28 }
 0x156   : > { %v363_v9 = vpop.permute.xlu0 %362 }
 0x157   : > { %v368_v18 = vadd.f32 %v363_v9, %v345_v13 }
 0x158   : > { %v365_v10 = vpop.permute.xlu1 %364 }
 0x159   : > { %v369_v19 = vadd.f32 %v365_v10, %v346_v17 }
 0x15a   : > { %v384_v12 = vpop.permute.xlu0 %383 }
 0x15b   : > { %v389_v21 = vadd.f32 %v384_v12, %v368_v18  ;;  %v631_v12 = vmul.f32 %v1252_v6, %v1843_v45 }
 0x15c   : > { %v386_v14 = vpop.permute.xlu1 %385 }
 0x15d   : > { %v390_v23 = vadd.f32 %v386_v14, %v369_v19 }
 0x15e   : > { %v405_v20 = vpop.permute.xlu0 %404 }
 0x15f   : > { %v410_v25 = vadd.f32 %v405_v20, %v389_v21 }
 0x160   : > { %v407_v22 = vpop.permute.xlu1 %406 }
 0x161   : > { %v411_v26 = vadd.f32 %v407_v22, %v390_v23 }
 0x162   : > { %v426_v27 = vpop.permute.xlu0 %425 }
 0x163   : > { %v431_v28 = vadd.f32 %v426_v27, %v410_v25  ;;  %v1257_v27 = vld [vmem:[#allocation6 + $0x14] ss:$0 sm:$0xff] }
 0x164   : > { %v428_v29 = vpop.permute.xlu1 %427  ;;  %v725_v45 = vmul.f32 %v1257_v27, %v1860_v58 }
 0x165   : > { %v432_v33 = vadd.f32 %v428_v29, %v411_v26  ;;  %v442_v34 = vadd.f32 %v440_v32, %v431_v28 }
 0x166   : > { %v458_v35 = vpop.permute.xlu0 %457 }
 0x167   : > { %v443_v3 = vadd.f32 %v441_v1, %v432_v33  ;;  %v463_v39 = vadd.f32 %v458_v35, %v442_v34  ;;  %v726_v34 = vmul.f32 %v1257_v27, %v1863_v59 }
 0x168   : > { %v460_v36 = vpop.permute.xlu1 %459 }
 0x169   : > { %v464_v40 = vadd.f32 %v460_v36, %v443_v3 }
 0x16a   : > { %v479_v37 = vpop.permute.xlu0 %478 }
 0x16b   : > { %v484_v42 = vadd.f32 %v479_v37, %v463_v39 }
 0x16c   : > { %v481_v38 = vpop.permute.xlu1 %480 }
 0x16d   : > { %v485_v46 = vadd.f32 %v481_v38, %v464_v40 }
 0x16e   : > { %v500_v41 = vpop.permute.xlu0 %499 }
 0x16f   : > { %v505_v48 = vadd.f32 %v500_v41, %v484_v42 }
 0x170   : > { %v502_v43 = vpop.permute.xlu1 %501 }
 0x171   : > { %v506_v49 = vadd.f32 %v502_v43, %v485_v46 }
 0x172   : > { %v521_v50 = vpop.permute.xlu0 %520 }
 0x173   : > { %v526_v15 = vadd.f32 %v521_v50, %v505_v48 }
 0x174   : > { %v523_v51 = vpop.permute.xlu1 %522 }
 0x175   : > { %v527_v52 = vadd.f32 %v523_v51, %v506_v49  ;;  %v537_v54 = vadd.f32 %v535_v16, %v526_v15 }
 0x176   : > { %v553_v55 = vpop.permute.xlu0 %552 }
 0x177   : > { %v538_v56 = vadd.f32 %v536_v53, %v527_v52  ;;  %v558_v62 = vadd.f32 %v553_v55, %v537_v54 }
 0x178   : > { %v555_v57 = vpop.permute.xlu1 %554 }
 0x179   : > { %v559_v63 = vadd.f32 %v555_v57, %v538_v56 }
 0x17a   : > { %v574_v60 = vpop.permute.xlu0 %573 }
 0x17b   : > { %v579_v2 = vadd.f32 %v574_v60, %v558_v62 }
 0x17c   : > { %v576_v61 = vpop.permute.xlu1 %575 }
 0x17d   : > { %v580_v5 = vadd.f32 %v576_v61, %v559_v63 }
 0x17e   : > { %v595_v0 = vpop.permute.xlu0 %594 }
 0x17f   : > { %v600_v7 = vadd.f32 %v595_v0, %v579_v2 }
 0x180   : > { %v597_v4 = vpop.permute.xlu1 %596 }
 0x181   : > { %v601_v8 = vadd.f32 %v597_v4, %v580_v5 }
 0x182   : > { %v616_v9 = vpop.permute.xlu0 %615 }
 0x183   : > { %v621_v30 = vadd.f32 %v616_v9, %v600_v7 }
 0x184   : > { %v618_v10 = vpop.permute.xlu1 %617 }
 0x185   : > { %v622_v11 = vadd.f32 %v618_v10, %v601_v8  ;;  %v632_v13 = vadd.f32 %v630_v31, %v621_v30 }
 0x186   : > { %v648_v14 = vpop.permute.xlu0 %647 }
 0x187   : > { %v633_v17 = vadd.f32 %v631_v12, %v622_v11  ;;  %v653_v21 = vadd.f32 %v648_v14, %v632_v13 }
 0x188   : > { %v650_v18 = vpop.permute.xlu1 %649 }
 0x189   : > { %v654_v22 = vadd.f32 %v650_v18, %v633_v17 }
 0x18a   : > { %v669_v19 = vpop.permute.xlu0 %668 }
 0x18b   : > { %v674_v24 = vadd.f32 %v669_v19, %v653_v21 }
 0x18c   : > { %v671_v20 = vpop.permute.xlu1 %670 }
 0x18d   : > { %v675_v26 = vadd.f32 %v671_v20, %v654_v22 }
 0x18e   : > { %v690_v23 = vpop.permute.xlu0 %689 }
 0x18f   : > { %v695_v28 = vadd.f32 %v690_v23, %v674_v24 }
 0x190   : > { %v692_v25 = vpop.permute.xlu1 %691 }
 0x191   : > { %v696_v29 = vadd.f32 %v692_v25, %v675_v26 }
 0x192   : > { %v711_v32 = vpop.permute.xlu0 %710 }
 0x193   : > { %v716_v44 = vadd.f32 %v711_v32, %v695_v28 }
 0x194   : > { %v713_v33 = vpop.permute.xlu1 %712 }
 0x195   : > { %v717_v1 = vadd.f32 %v713_v33, %v696_v29  ;;  %v727_v35 = vadd.f32 %v725_v45, %v716_v44 }
 0x196   : > { %v743_v3 = vpop.permute.xlu0 %742 }
 0x197   : > { %v728_v36 = vadd.f32 %v726_v34, %v717_v1  ;;  %v748_v40 = vadd.f32 %v743_v3, %v727_v35 }
 0x198   : > { %v745_v37 = vpop.permute.xlu1 %744 }
 0x199   : > { %v749_v41 = vadd.f32 %v745_v37, %v728_v36 }
 0x19a   : > { %v764_v38 = vpop.permute.xlu0 %763 }
 0x19b   : > { %v769_v43 = vadd.f32 %v764_v38, %v748_v40 }
 0x19c   : > { %v766_v39 = vpop.permute.xlu1 %765 }
 0x19d   : > { %v770_v47 = vadd.f32 %v766_v39, %v749_v41 }
 0x19e   : > { %v785_v42 = vpop.permute.xlu0 %784 }
 0x19f   : > { %v790_v48 = vadd.f32 %v785_v42, %v769_v43 }
 0x1a0   : > { %v787_v46 = vpop.permute.xlu1 %786 }
 0x1a1   : > { %v791_v49 = vadd.f32 %v787_v46, %v770_v47 }
 0x1a2   : > { %v806_v50 = vpop.permute.xlu0 %805 }
 0x1a3   : > { %v1891_v15 = vadd.f32 %v806_v50, %v790_v48 }
 0x1a4   : > { %v808_v58 = vpop.permute.xlu1 %807 }
 0x1a5   : > { %v1893_v51 = vadd.f32 %v808_v58, %v791_v49  ;;  %815 = vrot.lane.b32.xlu0 %v1891_v15, %s1550_s6 }
 0x1a7   : > { %817 = vrot.lane.b32.xlu1 %v1893_v51, %s1550_s6  ;;  %s1565_s6 = smov 8  }
 0x1a9   : > { %821 = vrot.lane.b32.xlu0 %v1891_v15, %s1551_s12 }
 0x1ab   : > { %823 = vrot.lane.b32.xlu1 %v1893_v51, %s1551_s12  ;;  %s1566_s12 = smov 68  }
 0x1ad   : > { %827 = vrot.lane.b32.xlu0 %v1891_v15, %s1552_s13 }
 0x1af   : > { %829 = vrot.lane.b32.xlu1 %v1893_v51, %s1552_s13  ;;  %s1567_s13 = smov 84  }
 0x1b1   : > { %833 = vrot.lane.b32.xlu0 %v1891_v15, %s1553_s25 }
 0x1b3   : > { %835 = vrot.lane.b32.xlu1 %v1893_v51, %s1553_s25  ;;  %s1568_s25 = smov 76  }
 0x1b5   : > { %839 = vrot.lane.b32.xlu0 %v1891_v15, %s1554_s26 }
 0x1b7   : > { %841 = vrot.lane.b32.xlu1 %v1893_v51, %s1554_s26  ;;  %s1569_s26 = smov 24  }
 0x1b9   : > { %845 = vrot.lane.b32.xlu0 %v1891_v15, %s1555_s23 }
 0x1bb   : > { %847 = vrot.lane.b32.xlu1 %v1893_v51, %s1555_s23  ;;  %s1570_s23 = smov 100  }
 0x1bd   : > { %851 = vrot.lane.b32.xlu0 %v1891_v15, %s1556_s30 }
 0x1bf   : > { %853 = vrot.lane.b32.xlu1 %v1893_v51, %s1556_s30  ;;  %s1571_s30 = smov 92  }
 0x1c1   : > { %886 = vrot.lane.b32.xlu0 %v1891_v15, %s1557_s21 }
 0x1c3   : > { %888 = vrot.lane.b32.xlu1 %v1893_v51, %s1557_s21  ;;  %s1572_s21 = smov 40  }
 0x1c5   : > { %892 = vrot.lane.b32.xlu0 %v1891_v15, %s1549_s28 }
 0x1c7   : > { %894 = vrot.lane.b32.xlu1 %v1893_v51, %s1549_s28  ;;  %s1564_s28 = smov 60  }
 0x1c9   : > { %898 = vrot.lane.b32.xlu0 %v1891_v15, %s1558_s5 }
 0x1cb   : > { %900 = vrot.lane.b32.xlu1 %v1893_v51, %s1558_s5  ;;  %s1573_s5 = smov 116  }
 0x1cd   : > { %904 = vrot.lane.b32.xlu0 %v1891_v15, %s1559_s29 }
 0x1cf   : > { %906 = vrot.lane.b32.xlu1 %v1893_v51, %s1559_s29  ;;  %s1574_s29 = smov 56  }
 0x1d1   : > { %910 = vrot.lane.b32.xlu0 %v1891_v15, %s1560_s8 }
 0x1d3   : > { %912 = vrot.lane.b32.xlu1 %v1893_v51, %s1560_s8  ;;  %s1575_s8 = smov 72  }
 0x1d5   : > { %957 = vrot.lane.b32.xlu0 %v1891_v15, %s1561_s9 }
 0x1d7   : > { %959 = vrot.lane.b32.xlu1 %v1893_v51, %s1561_s9  ;;  %s1576_s9 = smov 20  }
 0x1d9   : > { %963 = vrot.lane.b32.xlu0 %v1891_v15, %s1562_s27 }
 0x1db   : > { %965 = vrot.lane.b32.xlu1 %v1893_v51, %s1562_s27  ;;  %s1577_s27 = smov 36  }
 0x1dd   : > { %969 = vrot.lane.b32.xlu0 %v1891_v15, %s1563_s24 }
 0x1df   : > { %971 = vrot.lane.b32.xlu1 %v1893_v51, %s1563_s24  ;;  %s1230_s24 = sshll.u32 %s1739_s10, 4 }
 0x1e1   : > { %916 = vrot.lane.b32.xlu0 %v1891_v15, %s1564_s28 }
 0x1e3   : > { %918 = vrot.lane.b32.xlu1 %v1893_v51, %s1564_s28 }
 0x1e5   : > { %975 = vrot.lane.b32.xlu0 %v1891_v15, %s1565_s6 }
 0x1e7   : > { %977 = vrot.lane.b32.xlu1 %v1893_v51, %s1565_s6 }
 0x1e9   : > { %1028 = vrot.lane.b32.xlu0 %v1891_v15, %s1566_s12 }
 0x1eb   : > { %1030 = vrot.lane.b32.xlu1 %v1893_v51, %s1566_s12 }
 0x1ed   : > { %1034 = vrot.lane.b32.xlu0 %v1891_v15, %s1567_s13 }
 0x1ef   : > { %1036 = vrot.lane.b32.xlu1 %v1893_v51, %s1567_s13  ;;  %s1273_s13 = sshll.u32 %s1627_s19, 8 }
 0x1f1   : > { %922 = vrot.lane.b32.xlu0 %v1891_v15, %s1568_s25 }
 0x1f3   : > { %924 = vrot.lane.b32.xlu1 %v1893_v51, %s1568_s25  ;;  %s242_s25 = scalar_lea.vmem [#allocation9], %s1230_s24 }
 0x1f5   : > { %981 = vrot.lane.b32.xlu0 %v1891_v15, %s1569_s26 }
 0x1f7   : > { %983 = vrot.lane.b32.xlu1 %v1893_v51, %s1569_s26  ;;  %s1126_s26 = sshll.u32 %s242_s25, 4  ;;  %s2031_s26 = int_to_ptr.vmem [resolvable:$true] %s1126_s26 }
 0x1f8   : > { %s1464_s19 = scalar_lea.vmem %s2031_s26, 256 }
 0x1f9   : > { %1040 = vrot.lane.b32.xlu0 %v1891_v15, %s1570_s23  ;;  %p1465_p5 = scmp.ne.s32.totalorder %s2031_s26, %s1464_s19 }
 0x1fb   : > { %1042 = vrot.lane.b32.xlu1 %v1893_v51, %s1570_s23  ;;  %p1466_p7 = pnand %p1465_p5, %p2094_p2 }
 0x1fd   : > { %928 = vrot.lane.b32.xlu0 %v1891_v15, %s1571_s30  ;;  %p1467_p12 = pneg %p1466_p7 }
 0x1ff   : > { %930 = vrot.lane.b32.xlu1 %v1893_v51, %s1571_s30 }
 0x201   : > { %987 = vrot.lane.b32.xlu0 %v1891_v15, %s1572_s21 }
 0x203   : > { %989 = vrot.lane.b32.xlu1 %v1893_v51, %s1572_s21  ;;  %s2029_s21 = scalar_lea.hbm %s2079_s4, %s1273_s13 }
 0x205   : > { %1046 = vrot.lane.b32.xlu0 %v1891_v15, %s1573_s5 }
 0x207   : > { %1048 = vrot.lane.b32.xlu1 %v1893_v51, %s1573_s5  ;;  %s1113_s5 = scalar_lea.sflag [#allocation5], %s1739_s10 }
 0x209   : > { %993 = vrot.lane.b32.xlu0 %v1891_v15, %s1574_s29 }
 0x20b   : > { %995 = vrot.lane.b32.xlu1 %v1893_v51, %s1574_s29  ;;  %s1579_s29 = smov [#allocation9]  }
 0x20d   : > { %1052 = vrot.lane.b32.xlu0 %v1891_v15, %s1544_s7 }
 0x20f   : > { %1054 = vrot.lane.b32.xlu1 %v1893_v51, %s1544_s7  ;;  %s1578_s7 = smov 52  }
 0x211   : > { %999 = vrot.lane.b32.xlu0 %v1891_v15, %s1575_s8 }
 0x213   : > { %1001 = vrot.lane.b32.xlu1 %v1893_v51, %s1575_s8  ;;  %s1468_s8 = sshll.u32 %s1579_s29, 4  ;;  %s1469_s8 = int_to_ptr.vmem [resolvable:$false] %s1468_s8 }
 0x214   : > { %p1471_p13 = scmp.lt.s32.totalorder %s2031_s26, %s1469_s8 }
 0x215   : > { %1058 = vrot.lane.b32.xlu0 %v1891_v15, %s1576_s9 }
 0x217   : > { %1060 = vrot.lane.b32.xlu1 %v1893_v51, %s1576_s9  ;;  %v816_v59 = vpop.permute.xlu0 %815  ;;  %s1470_s9 = scalar_lea.vmem %s1469_s8, 512 }
 0x218   : > { %v858_v52 = vsel %vm857_vm15, %v1891_v15, %v816_v59  ;;  %p1472_p0 = scmp.lt.s32.totalorder %s1470_s9, %s1464_s19 }
 0x219   : > { %v818_v16 = vpop.permute.xlu1 %817  ;;  %1064 = vrot.lane.b32.xlu0 %v1891_v15, %s1577_s27 }
 0x21a   : > { %v859_v54 = vsel %vm857_vm15, %v1893_v51, %v818_v16  ;;  %p1473_p10 = por %p1472_p0, %p1471_p13 }
 0x21b   : > { %1066 = vrot.lane.b32.xlu1 %v1893_v51, %s1577_s27  ;;  %v822_v53 = vpop.permute.xlu0 %821 }
 0x21c   : > { %v861_v55 = vsel %vm860_vm0, %v858_v52, %v822_v53  ;;  %v1262_v52 = vld [vmem:[#allocation8] ss:$0 sm:$0xff]  ;;  %p1474_p3 = pnand %p1473_p10, %p1467_p12 }
 0x21d   : > { %v824_v56 = vpop.permute.xlu1 %823  ;;  %1070 = vrot.lane.b32.xlu0 %v1891_v15, %s1578_s7 }
 0x21e   : > { %v862_v57 = vsel %vm860_vm0, %v859_v54, %v824_v56  ;;  %v1263_v54 = vld [vmem:[#allocation8 + $0x1] ss:$0 sm:$0xff] }
 0x21f   : > { %1072 = vrot.lane.b32.xlu1 %v1893_v51, %s1578_s7  ;;  %v828_v60 = vpop.permute.xlu0 %827 }
 0x220   : > { %v864_v61 = vsel %vm863_vm1, %v861_v55, %v828_v60 }
 0x221   : > { %v830_v62 = vpop.permute.xlu1 %829 }
 0x222   : > { %v865_v63 = vsel %vm863_vm1, %v862_v57, %v830_v62 }
 0x223   : > { %v834_v0 = vpop.permute.xlu0 %833 }
 0x224   : > { %v867_v2 = vsel %vm866_vm2, %v864_v61, %v834_v0 }
 0x225   : > { %v836_v4 = vpop.permute.xlu1 %835 }
 0x226   : > { %v868_v5 = vsel %vm866_vm2, %v865_v63, %v836_v4 }
 0x227   : > { %v840_v6 = vpop.permute.xlu0 %839 }
 0x228   : > { %v869_v7 = vsel %vm319_vm11, %v867_v2, %v840_v6 }
 0x229   : > { %v842_v8 = vpop.permute.xlu1 %841 }
 0x22a   : > { %v870_v9 = vsel %vm319_vm11, %v868_v5, %v842_v8 }
 0x22b   : > { %v846_v30 = vpop.permute.xlu0 %845 }
 0x22c   : > { %v872_v10 = vsel %vm871_vm3, %v869_v7, %v846_v30 }
 0x22d   : > { %v848_v31 = vpop.permute.xlu1 %847 }
 0x22e   : > { %v873_v11 = vsel %vm871_vm3, %v870_v9, %v848_v31 }
 0x22f   : > { %v852_v12 = vpop.permute.xlu0 %851 }
 0x230   : > { %v875_v13 = vsel %vm874_vm4, %v872_v10, %v852_v12 }
 0x231   : > { %v854_v14 = vpop.permute.xlu1 %853  ;;  %v882_v63 = vmul.f32 %v1262_v52, %v875_v13 }
 0x232   : > { %v876_v17 = vsel %vm874_vm4, %v873_v11, %v854_v14 }
 0x233   : > { %v887_v18 = vpop.permute.xlu0 %886  ;;  %v883_v4 = vmul.f32 %v1262_v52, %v876_v17 }
 0x235   : > { %v889_v19 = vpop.permute.xlu1 %888 }
 0x237   : > { %v893_v20 = vpop.permute.xlu0 %892 }
 0x238   : > { %v934_v21 = vsel %vm857_vm15, %v887_v18, %v893_v20 }
 0x239   : > { %v895_v22 = vpop.permute.xlu1 %894 }
 0x23a   : > { %v935_v23 = vsel %vm857_vm15, %v889_v19, %v895_v22 }
 0x23b   : > { %v899_v24 = vpop.permute.xlu0 %898 }
 0x23c   : > { %v936_v25 = vsel %vm860_vm0, %v934_v21, %v899_v24 }
 0x23d   : > { %v901_v26 = vpop.permute.xlu1 %900 }
 0x23e   : > { %v937_v27 = vsel %vm860_vm0, %v935_v23, %v901_v26 }
 0x23f   : > { %v905_v28 = vpop.permute.xlu0 %904 }
 0x240   : > { %v938_v29 = vsel %vm863_vm1, %v936_v25, %v905_v28  ;;  %v1264_v25 = vld [vmem:[#allocation8 + $0x2] ss:$0 sm:$0xff] }
 0x241   : > { %v907_v32 = vpop.permute.xlu1 %906 }
 0x242   : > { %v939_v44 = vsel %vm863_vm1, %v937_v27, %v907_v32 }
 0x243   : > { %v911_v33 = vpop.permute.xlu0 %910 }
 0x244   : > { %v940_v45 = vsel %vm866_vm2, %v938_v29, %v911_v33 }
 0x245   : > { %v913_v1 = vpop.permute.xlu1 %912 }
 0x246   : > { %v941_v34 = vsel %vm866_vm2, %v939_v44, %v913_v1 }
 0x247   : > { %v958_v35 = vpop.permute.xlu0 %957 }
 0x249   : > { %v960_v3 = vpop.permute.xlu1 %959 }
 0x24b   : > { %v964_v36 = vpop.permute.xlu0 %963 }
 0x24c   : > { %v1005_v12 = vsel %vm857_vm15, %v958_v35, %v964_v36 }
 0x24d   : > { %v966_v37 = vpop.permute.xlu1 %965 }
 0x24e   : > { %v1006_v14 = vsel %vm857_vm15, %v960_v3, %v966_v37 }
 0x24f   : > { %v970_v38 = vpop.permute.xlu0 %969 }
 0x250   : > { %v1007_v18 = vsel %vm860_vm0, %v1005_v12, %v970_v38 }
 0x251   : > { %v972_v39 = vpop.permute.xlu1 %971 }
 0x252   : > { %v1008_v19 = vsel %vm860_vm0, %v1006_v14, %v972_v39 }
 0x253   : > { %v917_v40 = vpop.permute.xlu0 %916 }
 0x254   : > { %v942_v53 = vsel %vm319_vm11, %v940_v45, %v917_v40 }
 0x255   : > { %v919_v41 = vpop.permute.xlu1 %918 }
 0x256   : > { %v943_v55 = vsel %vm319_vm11, %v941_v34, %v919_v41 }
 0x257   : > { %v976_v42 = vpop.permute.xlu0 %975 }
 0x258   : > { %v1009_v17 = vsel %vm863_vm1, %v1007_v18, %v976_v42 }
 0x259   : > { %v978_v43 = vpop.permute.xlu1 %977 }
 0x25a   : > { %v1010_v21 = vsel %vm863_vm1, %v1008_v19, %v978_v43 }
 0x25b   : > { %v1029_v46 = vpop.permute.xlu0 %1028 }
 0x25d   : > { %v1031_v47 = vpop.permute.xlu1 %1030 }
 0x25f   : > { %v1035_v48 = vpop.permute.xlu0 %1034 }
 0x260   : > { %v1076_v37 = vsel %vm857_vm15, %v1029_v46, %v1035_v48  ;;  %v1265_v46 = vld [vmem:[#allocation8 + $0x3] ss:$0 sm:$0xff] }
 0x261   : > { %v1037_v49 = vpop.permute.xlu1 %1036 }
 0x262   : > { %v1077_v38 = vsel %vm857_vm15, %v1031_v47, %v1037_v49 }
 0x263   : > { %v923_v50 = vpop.permute.xlu0 %922 }
 0x264   : > { %v944_v56 = vsel %vm871_vm3, %v942_v53, %v923_v50 }
 0x265   : > { %v925_v15 = vpop.permute.xlu1 %924 }
 0x266   : > { %v945_v60 = vsel %vm871_vm3, %v943_v55, %v925_v15  ;;  %v1266_v55 = vld [vmem:[%s2078_s3] ss:$0 sm:$0xff] }
 0x267   : > { %v982_v58 = vpop.permute.xlu0 %981 }
 0x268   : > { %v1011_v22 = vsel %vm866_vm2, %v1009_v17, %v982_v58 }
 0x269   : > { %v984_v51 = vpop.permute.xlu1 %983 }
 0x26a   : > { %v1012_v23 = vsel %vm866_vm2, %v1010_v21, %v984_v51 }
 0x26b   : > { %v1041_v59 = vpop.permute.xlu0 %1040 }
 0x26c   : > { %v1078_v39 = vsel %vm860_vm0, %v1076_v37, %v1041_v59 }
 0x26d   : > { %v1043_v16 = vpop.permute.xlu1 %1042 }
 0x26e   : > { %v1079_v41 = vsel %vm860_vm0, %v1077_v38, %v1043_v16 }
 0x26f   : > { %v929_v57 = vpop.permute.xlu0 %928 }
 0x270   : > { %v946_v61 = vsel %vm874_vm4, %v944_v56, %v929_v57 }
 0x271   : > { %v931_v62 = vpop.permute.xlu1 %930  ;;  %v953_v0 = vmul.f32 %v1263_v54, %v946_v61 }
 0x272   : > { %v947_v2 = vsel %vm874_vm4, %v945_v60, %v931_v62 }
 0x273   : > { %v954_v5 = vmul.f32 %v1263_v54, %v947_v2  ;;  %v955_v6 = vadd.f32 %v953_v0, %v882_v63  ;;  %v988_v7 = vpop.permute.xlu0 %987 }
 0x274   : > { %v1013_v24 = vsel %vm319_vm11, %v1011_v22, %v988_v7 }
 0x275   : > { %v956_v8 = vadd.f32 %v954_v5, %v883_v4  ;;  %v990_v9 = vpop.permute.xlu1 %989 }
 0x276   : > { %v1014_v26 = vsel %vm319_vm11, %v1012_v23, %v990_v9 }
 0x277   : > { %v1047_v30 = vpop.permute.xlu0 %1046 }
 0x278   : > { %v1080_v42 = vsel %vm863_vm1, %v1078_v39, %v1047_v30 }
 0x279   : > { %v1049_v10 = vpop.permute.xlu1 %1048 }
 0x27a   : > { %v1081_v50 = vsel %vm863_vm1, %v1079_v41, %v1049_v10 }
 0x27b   : > { %v994_v31 = vpop.permute.xlu0 %993 }
 0x27c   : > { %v1015_v27 = vsel %vm871_vm3, %v1013_v24, %v994_v31 }
 0x27d   : > { %v996_v11 = vpop.permute.xlu1 %995 }
 0x27e   : > { %v1016_v29 = vsel %vm871_vm3, %v1014_v26, %v996_v11 }
 0x27f   : > { %v1053_v13 = vpop.permute.xlu0 %1052 }
 0x280   : > { %v1082_v15 = vsel %vm866_vm2, %v1080_v42, %v1053_v13 }
 0x281   : > { %v1055_v20 = vpop.permute.xlu1 %1054 }
 0x282   : > { %v1083_v58 = vsel %vm866_vm2, %v1081_v50, %v1055_v20 }
 0x283   : > { %v1000_v28 = vpop.permute.xlu0 %999 }
 0x284   : > { %v1017_v32 = vsel %vm874_vm4, %v1015_v27, %v1000_v28 }
 0x285   : > { %v1002_v44 = vpop.permute.xlu1 %1001  ;;  %v1024_v33 = vmul.f32 %v1264_v25, %v1017_v32 }
 0x286   : > { %v1018_v45 = vsel %vm874_vm4, %v1016_v29, %v1002_v44 }
 0x287   : > { %v1025_v1 = vmul.f32 %v1264_v25, %v1018_v45  ;;  %v1026_v34 = vadd.f32 %v1024_v33, %v955_v6  ;;  %v1059_v35 = vpop.permute.xlu0 %1058 }
 0x288   : > { %v1084_v51 = vsel %vm319_vm11, %v1082_v15, %v1059_v35 }
 0x289   : > { %v1027_v3 = vadd.f32 %v1025_v1, %v956_v8  ;;  %v1061_v36 = vpop.permute.xlu1 %1060 }
 0x28a   : > { %v1085_v47 = vsel %vm319_vm11, %v1083_v58, %v1061_v36 }
 0x28b   : > { %v1065_v40 = vpop.permute.xlu0 %1064 }
 0x28c   : > { %v1086_v48 = vsel %vm871_vm3, %v1084_v51, %v1065_v40 }
 0x28d   : > { %v1067_v43 = vpop.permute.xlu1 %1066 }
 0x28e   : > { %v1087_v59 = vsel %vm871_vm3, %v1085_v47, %v1067_v43 }
 0x28f   : > { %v1071_v49 = vpop.permute.xlu0 %1070 }
 0x290   : > { %v1088_v16 = vsel %vm874_vm4, %v1086_v48, %v1071_v49 }
 0x291   : > { %v1073_v52 = vpop.permute.xlu1 %1072  ;;  %v1095_v53 = vmul.f32 %v1265_v46, %v1088_v16 }
 0x292   : > { %v1089_v54 = vsel %vm874_vm4, %v1087_v59, %v1073_v52 }
 0x293   : > { %v1096_v56 = vmul.f32 %v1265_v46, %v1089_v54  ;;  %v1097_v57 = vadd.f32 %v1095_v53, %v1026_v34 }
 0x295   : > { %v1098_v60 = vadd.f32 %v1096_v56, %v1027_v3  ;;  %v1106_v61 = vadd.f32 %v1266_v55, %v1097_v57 }
 0x297   : > { %v1107_v62 = vadd.f32 %v1266_v55, %v1098_v60  ;;  %v1108_v63 = vmax.f32 %v1106_v61, 0.0 }
 0x299   : > { %v1109_v0 = vmax.f32 %v1107_v62, 0.0  ;;  %1110 = vst [vmem:[%s242_s25] sm:$0xff] %v1108_v63 }
 0x29b   : > { %1111 = vst [vmem:[%s242_s25 + $0x8] sm:$0xff] %v1109_v0 }
 0x29c   : > { %1477 = shalt.err (!%p1474_p3)
}
 0x29d   : > { %s1478_s27 = scalar_lea.hbm %s2029_s21, 256  ;;  %s1482_s28 = scalar_lea.hbm %s2079_s4, 512 }
 0x29e   : > { %p1479_p11 = scmp.ne.s32.totalorder %s2029_s21, %s1478_s27  ;;  %p1483_p4 = scmp.lt.s32.totalorder %s2029_s21, %s2079_s4 }
 0x29f   : > { %p1484_p6 = scmp.lt.s32.totalorder %s1482_s28, %s1478_s27 }
 0x2a0   : > { %p1480_p9 = pnand %p1479_p11, %p2094_p2 }
 0x2a1   : > { %p1485_p8 = por %p1484_p6, %p1483_p4 }
 0x2a2   : > { %p1481_p1 = pneg %p1480_p9 }
 0x2a4   : > { %p1486_p5 = pnand %p1485_p8, %p1481_p1 }
 0x2a6   : > { %1489 = shalt.err (!%p1486_p5)
}
 0x2a7   : > { %s1580_s25 = smov 128  }
 0x2a8   : > { %1284 = dma.vmem_to_hbm [thread:$0]  (%p2094_p2), %s2031_s26, 256, %s2029_s21, %s1113_s5, %s1580_s25, %s1580_s25, %s1565_s6  }
 0x2a9 PF: > { %s1141_s23 = sand.u32 1, %s1520_s15   ;;  %p2095_p7 = scmp.ne.s32.totalorder %s2085_s22, 0 }
 0x2aa   : > { %p2096_p12 = scmp.ge.s32.totalorder %s1532_s18, 2  ;;  %s1142_s30 = scalar_lea.sflag [#allocation5], %s1141_s23 }
 0x2ac   : > { %p1298_p13 = pnand %p2096_p12, %p2095_p7 }
 0x2ae   : > { %p1299_p0 = pneg %p1298_p13 }
 0x2b0   : > { %1515 = dma.done.wait (%p1299_p0), %s1142_s30, 256  }
 0x2b1   : > { %1517 = vsyncadd (%p1299_p0), %s1142_s30, 4294967040  ;;  %p18_p10 = scmp.ge.s32.totalorder %s1681_s11, 4   ;;  %s2097_s15 = smov %s1524_s16 }
 0x2b2   : > { %s2098_s16 = smov %s1528_s17  ;;  %s2099_s17 = smov %s1697_s20 }
 0x2b3   : > { %s2100_s18 = smov %s1681_s11  ;;  %20 = sbr.rel (!%p18_p10) target bundleno = 6 (0x6), region = 92 }
 0x2b8   :  { %1147 = vsyncpa [#allocation4], 1 }
 0x2b9   :  { %1149 = vsyncpa [#allocation4 + $0x1], 1 }
 0x2ba   :  { %1150 = vsyncpa [#allocation7], 1 }
 0x2bb   :  { %1151 = vsyncpa [#allocation5], 1 }
 0x2bc   :  { %1153 = vsyncpa [#allocation5 + $0x1], 1 }

</bundles_post_ra>
